<compile_context>
chip_gen: v7x
topology: tpu7x:2x2x1
jax: 0.10.0
libtpu: 0.0.40
codegen_flags: <defaults>
</compile_context>

<pallas_src>
import functools

import jax
import jax.numpy as jnp
from jax.experimental import pallas as pl
from jax.experimental.pallas import tpu as pltpu

_F_IN = 39        # PyTorch input features
_F_PAD = 128      # lane-dense layer-1 contraction dim (39 features + 1 bias + zeros)
_DIMS = [(39, 256), (256, 256), (256, 256), (256, 128), (128, 1)]
_MAX_TILE_B = 1024


def _mlp_kernel(x_ref,
                w1_ref,
                w2_ref, b2_ref,
                w3_ref, b3_ref,
                w4_ref, b4_ref,
                w5_ref, b5_ref,
                o_ref,
                xpad_ref,
                *, bf16_elementwise):
    """Fused forward for one (tile_b,) batch tile."""
    tile_b = x_ref.shape[0]

    # Build the lane-dense (tile_b, 128) f32 layer-1 operand in VMEM:
    #   lanes [0, 39): input features, lanes [39, 128): 1.0.
    # Row 39 of w1 holds b1 (bias fold); rows 40..127 are zero, so the extra
    # ones contribute nothing.  Written every step so it is also correct when
    # the parallel grid axis is sharded across TensorCores (per-core scratch).
    xpad_ref[:, _F_IN:] = jnp.ones((tile_b, _F_PAD - _F_IN), jnp.float32)
    xpad_ref[:, :_F_IN] = x_ref[...]
    x128 = xpad_ref[...]                                            # (tile_b, 128) f32

    def act(acc):
        # relu(cast(x)) == cast(relu(x)); the order only decides whether the
        # VPU does the ReLU on bf16 vregs (v6e/v7x) or f32 vregs (v5e).
        if bf16_elementwise:
            return jnp.maximum(acc.astype(jnp.bfloat16), 0)
        return jnp.maximum(acc, 0.0).astype(jnp.bfloat16)

    # Layer 1: full-precision f32 MXU matmul, bias already folded into w1.
    h = act(jnp.dot(x128, w1_ref[...], preferred_element_type=jnp.float32))

    # Layers 2-4: bf16 MXU matmuls with f32 accumulation, bias add in f32.
    h = act(jnp.dot(h, w2_ref[...], preferred_element_type=jnp.float32) + b2_ref[...])
    h = act(jnp.dot(h, w3_ref[...], preferred_element_type=jnp.float32) + b3_ref[...])
    h = act(jnp.dot(h, w4_ref[...], preferred_element_type=jnp.float32) + b4_ref[...])
    # h: (tile_b, 128) bf16

    # Layer 5 (128 -> 1) on otherwise-idle XLU/VPU slots: bf16 transpose (half
    # the XLU vregs vs f32), f32 multiply + sublane reduce, lane-dense output.
    hT = h.T                                                        # (128, tile_b) bf16
    z = jnp.sum(hT.astype(jnp.float32) * w5_ref[...], axis=0, keepdims=True)
    z = z + b5_ref[...]                                             # (1, tile_b) f32
    o_ref[...] = jax.nn.sigmoid(z).astype(o_ref.dtype)


def _bf16_elementwise():
    """bf16 VALU path on v6e/v7x; keep elementwise f32 on v5e and older."""
    try:
        kind = jax.devices()[0].device_kind.lower()
    except Exception:
        return True
    return not any(tag in kind for tag in ("v2", "v3", "v4", "v5"))


def _choose_tile_b(batch):
    """Largest tile (multiple of 128, <= _MAX_TILE_B) that keeps >= 2 grid steps."""
    half = (batch + 1) // 2
    t = ((half + 127) // 128) * 128
    return int(max(128, min(_MAX_TILE_B, t)))


@functools.partial(jax.jit, static_argnames=("tile_b",))
def mlp_struct_forward(x, params, *, tile_b=None):
    """x: (B, 39) float32. params: list of (W, b), W stored as (in, out)."""
    B, F = x.shape
    assert F == _F_IN, f"expected {_F_IN} input features, got {F}"
    if tile_b is None:
        tile_b = _choose_tile_b(B)
    assert tile_b % 128 == 0 and tile_b >= 128, "tile_b must be a multiple of 128"

    grid_b = pl.cdiv(B, tile_b)
    Bp = grid_b * tile_b

    (w1, b1), (w2, b2), (w3, b3), (w4, b4), (w5, b5) = params

    # Layer-1 weight: rows 0..38 = W1, row 39 = b1 (bias fold), rows 40..127 = 0.
    w1p = jnp.zeros((_F_PAD, 256), jnp.float32)
    w1p = w1p.at[:_F_IN, :].set(w1.astype(jnp.float32))
    w1p = w1p.at[_F_IN, :].set(b1.reshape(-1).astype(jnp.float32))

    w2b = w2.astype(jnp.bfloat16); b2r = b2.reshape(1, -1).astype(jnp.float32)
    w3b = w3.astype(jnp.bfloat16); b3r = b3.reshape(1, -1).astype(jnp.float32)
    w4b = w4.astype(jnp.bfloat16); b4r = b4.reshape(1, -1).astype(jnp.float32)
    w5c = w5.reshape(_F_PAD, 1).astype(jnp.float32)
    b5r = b5.reshape(1, 1).astype(jnp.float32)

    # x stays f32 and un-padded on the feature axis (no HBM pad/cast round trip);
    # only the batch is padded, and only when the tile does not divide it.
    xb = x if B == Bp else jnp.pad(x, ((0, Bp - B), (0, 0)))

    flat = [xb, w1p, w2b, b2r, w3b, b3r, w4b, b4r, w5c, b5r]

    # x is tiled over the batch; all weights/biases are full-array blocks with a
    # constant index_map (VMEM-resident across the whole grid).
    def resident(a):
        return pl.BlockSpec(a.shape, lambda i: (0, 0))

    in_specs = [pl.BlockSpec((tile_b, _F_IN), lambda i: (i, 0))]
    in_specs += [resident(a) for a in flat[1:]]

    # Lane-dense output: batch lives on the 128-lane axis.
    out_specs = pl.BlockSpec((1, tile_b), lambda i: (0, i))

    flops = 2 * Bp * (_F_PAD * 256 + 256 * 256 + 256 * 256 + 256 * 128 + 128)
    bytes_accessed = sum(int(a.size) * a.dtype.itemsize for a in flat) + Bp * 4
    cost = pl.CostEstimate(flops=int(flops),
                           transcendentals=int(Bp),
                           bytes_accessed=int(bytes_accessed))

    kernel = functools.partial(_mlp_kernel, bf16_elementwise=_bf16_elementwise())

    out = pl.pallas_call(
        kernel,
        out_shape=jax.ShapeDtypeStruct((1, Bp), jnp.float32),
        grid=(grid_b,),
        in_specs=in_specs,
        out_specs=out_specs,
        scratch_shapes=[pltpu.VMEM((tile_b, _F_PAD), jnp.float32)],
        compiler_params=pltpu.CompilerParams(
            dimension_semantics=("parallel",),
        ),
        cost_estimate=cost,
    )(*flat)

    return out[0, :B][:, None]                       # back to (B, 1)


def init_params(key):
    """PyTorch Linear default init: U(-1/sqrt(fan_in), 1/sqrt(fan_in))."""
    params = []
    for fan_in, fan_out in _DIMS:
        key, kw, kb = jax.random.split(key, 3)
        bound = 1.0 / jnp.sqrt(float(fan_in))
        w = jax.random.uniform(kw, (fan_in, fan_out), jnp.float32, -bound, bound)
        b = jax.random.uniform(kb, (1, fan_out), jnp.float32, -bound, bound)
        params.append((w, b))
    return params


def reference_forward(x, params):
    """Plain-JAX f32 reference matching the PyTorch module."""
    h = x
    for i, (w, b) in enumerate(params):
        h = h @ w + b
        if i < len(params) - 1:
            h = jnp.maximum(h, 0.0)
    return jax.nn.sigmoid(h)


if __name__ == "__main__":
    key = jax.random.PRNGKey(0)
    key, kx = jax.random.split(key)

    B, F = 300, 39                     # non-multiple batch exercises padding path
    x = jax.random.normal(kx, (B, F), dtype=jnp.float32)
    params = init_params(key)

    out = mlp_struct_forward(x, params)            # auto tile: 256 -> 2 grid steps
    out = jax.block_until_ready(out)

    ref = reference_forward(x, params)
    assert out.shape == (B, 1), out.shape
    max_err = float(jnp.max(jnp.abs(out - ref)))
    # Layer 1 is f32; layers 2-4 use bf16 MXU operands with f32 accumulation.
    assert max_err < 2e-2, f"mismatch vs reference: max abs err {max_err}"

    print("KERNEL_OK")
</pallas_src>

<mosaic_0001>
module attributes {stable_mosaic.version = 11 : i64} {
  func.func @_mlp_kernel(%arg0: i32, %arg1: memref<256x39xf32, #tpu.memory_space<vmem>>, %arg2: memref<128x256xf32, #tpu.memory_space<vmem>>, %arg3: memref<256x256xbf16, #tpu.memory_space<vmem>>, %arg4: memref<1x256xf32, #tpu.memory_space<vmem>>, %arg5: memref<256x256xbf16, #tpu.memory_space<vmem>>, %arg6: memref<1x256xf32, #tpu.memory_space<vmem>>, %arg7: memref<256x128xbf16, #tpu.memory_space<vmem>>, %arg8: memref<1x128xf32, #tpu.memory_space<vmem>>, %arg9: memref<128x1xf32, #tpu.memory_space<vmem>>, %arg10: memref<1x1xf32, #tpu.memory_space<vmem>>, %arg11: memref<1x256xf32, #tpu.memory_space<vmem>>, %arg12: memref<256x128xf32, #tpu.memory_space<vmem>>) attributes {dimension_semantics = [#tpu.dimension_semantics<parallel>], iteration_bounds = array<i64: 2>, scalar_prefetch = 0 : i64, scratch_operands = 1 : i64, tpu.core_type = #tpu.core_type<tc>, window_params = [{transform_indices = @transform_0, window_bounds = array<i64: 256, 39>}, {pipeline_mode = #tpu.pipeline_mode<synchronous>, transform_indices = @transform_1, window_bounds = array<i64: 128, 256>}, {pipeline_mode = #tpu.pipeline_mode<synchronous>, transform_indices = @transform_2, window_bounds = array<i64: 256, 256>}, {pipeline_mode = #tpu.pipeline_mode<synchronous>, transform_indices = @transform_3, window_bounds = array<i64: 1, 256>}, {pipeline_mode = #tpu.pipeline_mode<synchronous>, transform_indices = @transform_4, window_bounds = array<i64: 256, 256>}, {pipeline_mode = #tpu.pipeline_mode<synchronous>, transform_indices = @transform_5, window_bounds = array<i64: 1, 256>}, {pipeline_mode = #tpu.pipeline_mode<synchronous>, transform_indices = @transform_6, window_bounds = array<i64: 256, 128>}, {pipeline_mode = #tpu.pipeline_mode<synchronous>, transform_indices = @transform_7, window_bounds = array<i64: 1, 128>}, {pipeline_mode = #tpu.pipeline_mode<synchronous>, transform_indices = @transform_8, window_bounds = array<i64: 128, 1>}, {pipeline_mode = #tpu.pipeline_mode<synchronous>, transform_indices = @transform_9, window_bounds = array<i64: 1, 1>}, {transform_indices = @transform_10, window_bounds = array<i64: 1, 256>}]} {
    %cst = arith.constant 1.000000e+00 : f32
    %0 = vector.broadcast %cst : f32 to vector<256x89xf32>
    %c0 = arith.constant 0 : index
    %c39 = arith.constant 39 : index
    %1 = vector.load %arg12[%c0, %c39] : memref<256x128xf32, #tpu.memory_space<vmem>>, vector<256x89xf32>
    tpu.vector_store %arg12[%c0, %c39], %0 {strides = array<i32>} : memref<256x128xf32, #tpu.memory_space<vmem>>, vector<256x89xf32>,
    %c0_0 = arith.constant 0 : index
    %c0_1 = arith.constant 0 : index
    %2 = vector.load %arg1[%c0_0, %c0_1] : memref<256x39xf32, #tpu.memory_space<vmem>>, vector<256x39xf32>
    %c0_2 = arith.constant 0 : index
    %c0_3 = arith.constant 0 : index
    %3 = vector.load %arg12[%c0_2, %c0_3] : memref<256x128xf32, #tpu.memory_space<vmem>>, vector<256x39xf32>
    tpu.vector_store %arg12[%c0_2, %c0_3], %2 {strides = array<i32>} : memref<256x128xf32, #tpu.memory_space<vmem>>, vector<256x39xf32>,
    %c0_4 = arith.constant 0 : index
    %c0_5 = arith.constant 0 : index
    %4 = vector.load %arg12[%c0_4, %c0_5] : memref<256x128xf32, #tpu.memory_space<vmem>>, vector<256x128xf32>
    %c0_6 = arith.constant 0 : index
    %c0_7 = arith.constant 0 : index
    %5 = vector.load %arg2[%c0_6, %c0_7] : memref<128x256xf32, #tpu.memory_space<vmem>>, vector<128x256xf32>
    %cst_8 = arith.constant dense<0.000000e+00> : vector<256x256xf32>
    %6 = tpu.matmul %4, %5, %cst_8 {dimension_numbers = #tpu.dot_dimension_numbers<[1], [0], [0], [1], [0, 0, 1, 1], [], []>} : vector<256x128xf32>, vector<128x256xf32>, vector<256x256xf32> -> vector<256x256xf32>
    %7 = arith.truncf %6 : vector<256x256xf32> to vector<256x256xbf16>
    %cst_9 = arith.constant 0.000000e+00 : bf16
    %8 = vector.broadcast %cst_9 : bf16 to vector<256x256xbf16>
    %9 = arith.maximumf %7, %8 : vector<256x256xbf16>
    %c0_10 = arith.constant 0 : index
    %c0_11 = arith.constant 0 : index
    %10 = vector.load %arg3[%c0_10, %c0_11] : memref<256x256xbf16, #tpu.memory_space<vmem>>, vector<256x256xbf16>
    %cst_12 = arith.constant dense<0.000000e+00> : vector<256x256xf32>
    %11 = tpu.matmul %9, %10, %cst_12 {dimension_numbers = #tpu.dot_dimension_numbers<[1], [0], [0], [1], [0, 0, 1, 1], [], []>} : vector<256x256xbf16>, vector<256x256xbf16>, vector<256x256xf32> -> vector<256x256xf32>
    %c0_13 = arith.constant 0 : index
    %c0_14 = arith.constant 0 : index
    %12 = vector.load %arg4[%c0_13, %c0_14] : memref<1x256xf32, #tpu.memory_space<vmem>>, vector<1x256xf32>
    %13 = vector.broadcast %12 : vector<1x256xf32> to vector<256x256xf32>
    %14 = arith.addf %11, %13 : vector<256x256xf32>
    %15 = arith.truncf %14 : vector<256x256xf32> to vector<256x256xbf16>
    %cst_15 = arith.constant 0.000000e+00 : bf16
    %16 = vector.broadcast %cst_15 : bf16 to vector<256x256xbf16>
    %17 = arith.maximumf %15, %16 : vector<256x256xbf16>
    %c0_16 = arith.constant 0 : index
    %c0_17 = arith.constant 0 : index
    %18 = vector.load %arg5[%c0_16, %c0_17] : memref<256x256xbf16, #tpu.memory_space<vmem>>, vector<256x256xbf16>
    %cst_18 = arith.constant dense<0.000000e+00> : vector<256x256xf32>
    %19 = tpu.matmul %17, %18, %cst_18 {dimension_numbers = #tpu.dot_dimension_numbers<[1], [0], [0], [1], [0, 0, 1, 1], [], []>} : vector<256x256xbf16>, vector<256x256xbf16>, vector<256x256xf32> -> vector<256x256xf32>
    %c0_19 = arith.constant 0 : index
    %c0_20 = arith.constant 0 : index
    %20 = vector.load %arg6[%c0_19, %c0_20] : memref<1x256xf32, #tpu.memory_space<vmem>>, vector<1x256xf32>
    %21 = vector.broadcast %20 : vector<1x256xf32> to vector<256x256xf32>
    %22 = arith.addf %19, %21 : vector<256x256xf32>
    %23 = arith.truncf %22 : vector<256x256xf32> to vector<256x256xbf16>
    %cst_21 = arith.constant 0.000000e+00 : bf16
    %24 = vector.broadcast %cst_21 : bf16 to vector<256x256xbf16>
    %25 = arith.maximumf %23, %24 : vector<256x256xbf16>
    %c0_22 = arith.constant 0 : index
    %c0_23 = arith.constant 0 : index
    %26 = vector.load %arg7[%c0_22, %c0_23] : memref<256x128xbf16, #tpu.memory_space<vmem>>, vector<256x128xbf16>
    %cst_24 = arith.constant dense<0.000000e+00> : vector<256x128xf32>
    %27 = tpu.matmul %25, %26, %cst_24 {dimension_numbers = #tpu.dot_dimension_numbers<[1], [0], [0], [1], [0, 0, 1, 1], [], []>} : vector<256x256xbf16>, vector<256x128xbf16>, vector<256x128xf32> -> vector<256x128xf32>
    %c0_25 = arith.constant 0 : index
    %c0_26 = arith.constant 0 : index
    %28 = vector.load %arg8[%c0_25, %c0_26] : memref<1x128xf32, #tpu.memory_space<vmem>>, vector<1x128xf32>
    %29 = vector.broadcast %28 : vector<1x128xf32> to vector<256x128xf32>
    %30 = arith.addf %27, %29 : vector<256x128xf32>
    %31 = arith.truncf %30 : vector<256x128xf32> to vector<256x128xbf16>
    %cst_27 = arith.constant 0.000000e+00 : bf16
    %32 = vector.broadcast %cst_27 : bf16 to vector<256x128xbf16>
    %33 = arith.maximumf %31, %32 : vector<256x128xbf16>
    %34 = tpu.transpose %33, [1, 0] : vector<256x128xbf16> -> vector<128x256xbf16>
    %35 = arith.extf %34 : vector<128x256xbf16> to vector<128x256xf32>
    %c0_28 = arith.constant 0 : index
    %c0_29 = arith.constant 0 : index
    %36 = vector.load %arg9[%c0_28, %c0_29] : memref<128x1xf32, #tpu.memory_space<vmem>>, vector<128x1xf32>
    %37 = vector.broadcast %36 : vector<128x1xf32> to vector<128x256xf32>
    %38 = arith.mulf %35, %37 : vector<128x256xf32>
    %cst_30 = arith.constant dense<0.000000e+00> : vector<256xf32>
    %39 = vector.multi_reduction <add>, %38, %cst_30 [0] : vector<128x256xf32> to vector<256xf32>
    %40 = vector.shape_cast %39 : vector<256xf32> to vector<1x256xf32>
    %c0_31 = arith.constant 0 : index
    %c0_32 = arith.constant 0 : index
    %41 = vector.load %arg10[%c0_31, %c0_32] : memref<1x1xf32, #tpu.memory_space<vmem>>, vector<1x1xf32>
    %42 = vector.broadcast %41 : vector<1x1xf32> to vector<1x256xf32>
    %43 = arith.addf %40, %42 : vector<1x256xf32>
    %44 = arith.negf %43 : vector<1x256xf32>
    %45 = math.exp %44 : vector<1x256xf32>
    %cst_33 = arith.constant 1.000000e+00 : f32
    %46 = vector.broadcast %cst_33 : f32 to vector<1x256xf32>
    %47 = arith.addf %46, %45 : vector<1x256xf32>
    %48 = arith.divf %46, %47 : vector<1x256xf32>
    %c0_34 = arith.constant 0 : index
    %c0_35 = arith.constant 0 : index
    %49 = vector.load %arg11[%c0_34, %c0_35] : memref<1x256xf32, #tpu.memory_space<vmem>>, vector<1x256xf32>
    tpu.vector_store %arg11[%c0_34, %c0_35], %48 {strides = array<i32>} : memref<1x256xf32, #tpu.memory_space<vmem>>, vector<1x256xf32>,
    return
  }
  func.func @transform_0(%arg0: i32) -> (i32, i32) {
    %c0_i32 = arith.constant 0 : i32
    %c0_i32_0 = arith.constant 0 : i32
    return %arg0, %c0_i32 : i32, i32
  }
  func.func @transform_1(%arg0: i32) -> (i32, i32) {
    %c0_i32 = arith.constant 0 : i32
    %c0_i32_0 = arith.constant 0 : i32
    %c0_i32_1 = arith.constant 0 : i32
    return %c0_i32, %c0_i32_0 : i32, i32
  }
  func.func @transform_2(%arg0: i32) -> (i32, i32) {
    %c0_i32 = arith.constant 0 : i32
    %c0_i32_0 = arith.constant 0 : i32
    %c0_i32_1 = arith.constant 0 : i32
    return %c0_i32, %c0_i32_0 : i32, i32
  }
  func.func @transform_3(%arg0: i32) -> (i32, i32) {
    %c0_i32 = arith.constant 0 : i32
    %c0_i32_0 = arith.constant 0 : i32
    %c0_i32_1 = arith.constant 0 : i32
    return %c0_i32, %c0_i32_0 : i32, i32
  }
  func.func @transform_4(%arg0: i32) -> (i32, i32) {
    %c0_i32 = arith.constant 0 : i32
    %c0_i32_0 = arith.constant 0 : i32
    %c0_i32_1 = arith.constant 0 : i32
    return %c0_i32, %c0_i32_0 : i32, i32
  }
  func.func @transform_5(%arg0: i32) -> (i32, i32) {
    %c0_i32 = arith.constant 0 : i32
    %c0_i32_0 = arith.constant 0 : i32
    %c0_i32_1 = arith.constant 0 : i32
    return %c0_i32, %c0_i32_0 : i32, i32
  }
  func.func @transform_6(%arg0: i32) -> (i32, i32) {
    %c0_i32 = arith.constant 0 : i32
    %c0_i32_0 = arith.constant 0 : i32
    %c0_i32_1 = arith.constant 0 : i32
    return %c0_i32, %c0_i32_0 : i32, i32
  }
  func.func @transform_7(%arg0: i32) -> (i32, i32) {
    %c0_i32 = arith.constant 0 : i32
    %c0_i32_0 = arith.constant 0 : i32
    %c0_i32_1 = arith.constant 0 : i32
    return %c0_i32, %c0_i32_0 : i32, i32
  }
  func.func @transform_8(%arg0: i32) -> (i32, i32) {
    %c0_i32 = arith.constant 0 : i32
    %c0_i32_0 = arith.constant 0 : i32
    %c0_i32_1 = arith.constant 0 : i32
    return %c0_i32, %c0_i32_0 : i32, i32
  }
  func.func @transform_9(%arg0: i32) -> (i32, i32) {
    %c0_i32 = arith.constant 0 : i32
    %c0_i32_0 = arith.constant 0 : i32
    %c0_i32_1 = arith.constant 0 : i32
    return %c0_i32, %c0_i32_0 : i32, i32
  }
  func.func @transform_10(%arg0: i32) -> (i32, i32) {
    %c0_i32 = arith.constant 0 : i32
    %c0_i32_0 = arith.constant 0 : i32
    return %c0_i32, %arg0 : i32, i32
  }
}

</mosaic_0001>

<bundles_post_ra>
// kernel: mlp_struct_forward.1
= control target key start
LH: loop header
LB: loop body
LE: loop exit
PB: predicated region body
PF: predicated region fallthrough
CT: control target
= control target key end

     0   :  { %s2885_s15 = smov 0   ;;  %s3762_s0 = inlined_call_operand.vmem [shape: f32[512,39], index: 0, kind: input, shape index: {}]   ;;  %s3763_s1 = inlined_call_operand.vmem [shape: f32[128,256], index: 1, kind: input, shape index: {}]   ;;  %s3764_s2 = inlined_call_operand.vmem [shape: bf16[256,256], index: 2, kind: input, shape index: {}]   ;;  %s3765_s3 = inlined_call_operand.vmem [shape: f32[1,256], index: 3, kind: input, shape index: {}]   ;;  %s3766_s4 = inlined_call_operand.vmem [shape: bf16[256,256], index: 4, kind: input, shape index: {}]   ;;  %s3767_s5 = inlined_call_operand.vmem [shape: f32[1,256], index: 5, kind: input, shape index: {}]   ;;  %s3768_s6 = inlined_call_operand.vmem [shape: bf16[256,128], index: 6, kind: input, shape index: {}]   ;;  %s3769_s7 = inlined_call_operand.vmem [shape: f32[1,128], index: 7, kind: input, shape index: {}]   ;;  %s3770_s8 = inlined_call_operand.vmem [shape: f32[128,1], index: 8, kind: input, shape index: {}]   ;;  %s3771_s9 = inlined_call_operand.<no memory space> [shape: f32[1,1], index: 9, kind: input, shape index: {}]   ;;  %s3772_s10 = inlined_call_operand.vmem [shape: f32[1,512], index: 10, kind: output, shape index: {}]  }
   0x1   :  { %v15_v0 = vstv %s3771_s9 }
   0x2   :  { %16 = vst [vmem:[#allocation3] sm:$0x1] %v15_v0 }
   0x3 LB: > { %s2428_s16 = sadd.s32 4294967295, %s2821_s15   ;;  %p2432_p0 = scmp.ge.s32.totalorder %s2821_s15, 1  ;;  %s2821_s15 = sphi %s2885_s15, %s22_s15  }
   0x4   : > { %p315_p1 = scmp.lt.s32.totalorder %s2821_s15, 3 }
   0x6   : > { %p316_p2 = pnand %p2432_p0, %p315_p1 }
   0x7   : > { %v495_v1 = vld [vmem:[%s3763_s1 + $0x8] sm:$0xff] (!%p316_p2)  ;;  %v497_v2 = vld [vmem:[%s3763_s1 + $0x18] sm:$0xff] (!%p316_p2)  ;;  %v494_v3 = vld [vmem:[%s3763_s1] sm:$0xff] (!%p316_p2)  ;;  %s2904_s22 = sshll.u32 (!%p316_p2), %s2428_s16, 5  ;;  %vm364_vm0 = vcmask (!%p316_p2), 1047864   ;;  %v2823_v8 = vmov (!%p316_p2), 0.0  }
   0x8   : > { %319 = sbr.rel (%p316_p2) target bundleno = 1235 (0x4d3), region = 60  ;;  %v2633_v4 = vpack.c.bf16 (!%p316_p2), %v497_v2, %v495_v1  ;;  %v496_v5 = vld [vmem:[%s3763_s1 + $0x10] sm:$0xff] (!%p316_p2)  ;;  %v499_v6 = vld [vmem:[%s3763_s1 + $0x28] sm:$0xff] (!%p316_p2)  ;;  %v501_v7 = vld [vmem:[%s3763_s1 + $0x38] sm:$0xff] (!%p316_p2)  ;;  %590 = vmatprep.mubr.f32.mxu0 (!%p316_p2), %v2823_v8  ;;  %p353_p3 = scmp.lt.s32.totalorder (!%p316_p2), %s2904_s22, 63  ;;  %v2824_v14 = vmov (!%p316_p2), 1.0  }
   0x9   : > { %v2635_v9 = vpack.c.bf16 (!%p316_p2), %v496_v5, %v494_v3  ;;  %v2637_v10 = vpack.c.bf16 (!%p316_p2), %v501_v7, %v499_v6  ;;  %v498_v11 = vld [vmem:[%s3763_s1 + $0x20] sm:$0xff] (!%p316_p2)  ;;  %v500_v12 = vld [vmem:[%s3763_s1 + $0x30] sm:$0xff] (!%p316_p2)  ;;  %v503_v13 = vld [vmem:[%s3763_s1 + $0x48] sm:$0xff] (!%p316_p2)  ;;  %365 = vst.msk [vmem:[#allocation2] sm:$0xff] (!%p316_p2), %vm364_vm0, %v2824_v14  ;;  %vm429_vm1 = vcmask (!%p316_p2), 318464   ;;  %s2435_s9 = sshll.u32 (!%p316_p2), %s2428_s16, 1 }
   0xa   : > { %366 = vst.msk [vmem:[#allocation2 + $0x8] sm:$0xff] (!%p316_p2), %vm364_vm0, %v2824_v14  ;;  %367 = vst.msk [vmem:[#allocation2 + $0x10] sm:$0xff] (!%p316_p2), %vm364_vm0, %v2824_v14  ;;  %2634 = vmatprep.subr.bf16.mxu0 (!%p316_p2), %v2633_v4  ;;  %v505_v15 = vld [vmem:[%s3763_s1 + $0x58] sm:$0xff] (!%p316_p2)  ;;  %v2639_v16 = vpack.c.bf16 (!%p316_p2), %v500_v12, %v498_v11  ;;  %v502_v18 = vld [vmem:[%s3763_s1 + $0x40] sm:$0xff] (!%p316_p2)  ;;  %p359_p4 = scmp.lt.s32.totalorder (!%p316_p2), %s2435_s9, 3 }
   0xb   : > { %368 = vst.msk [vmem:[#allocation2 + $0x18] sm:$0xff] (!%p316_p2), %vm364_vm0, %v2824_v14  ;;  %369 = vst.msk [vmem:[#allocation2 + $0x20] sm:$0xff] (!%p316_p2), %vm364_vm0, %v2824_v14  ;;  %2636 = vmatpush1.bf16.msra.mxu0 (!%p316_p2), %v2635_v9  ;;  %v2641_v17 = vpack.c.bf16 (!%p316_p2), %v505_v15, %v503_v13  ;;  %v504_v19 = vld [vmem:[%s3763_s1 + $0x50] sm:$0xff] (!%p316_p2)  ;;  %v507_v20 = vld [vmem:[%s3763_s1 + $0x68] sm:$0xff] (!%p316_p2) }
   0xc   : > { %370 = vst.msk [vmem:[#allocation2 + $0x28] sm:$0xff] (!%p316_p2), %vm364_vm0, %v2824_v14  ;;  %371 = vst.msk [vmem:[#allocation2 + $0x30] sm:$0xff] (!%p316_p2), %vm364_vm0, %v2824_v14  ;;  %2638 = vmatprep.subr.bf16.mxu0 (!%p316_p2), %v2637_v10  ;;  %v509_v21 = vld [vmem:[%s3763_s1 + $0x78] sm:$0xff] (!%p316_p2)  ;;  %v2643_v22 = vpack.c.bf16 (!%p316_p2), %v504_v19, %v502_v18  ;;  %v506_v24 = vld [vmem:[%s3763_s1 + $0x60] sm:$0xff] (!%p316_p2) }
   0xd   : > { %372 = vst.msk [vmem:[#allocation2 + $0x38] sm:$0xff] (!%p316_p2), %vm364_vm0, %v2824_v14  ;;  %373 = vst.msk [vmem:[#allocation2 + $0x40] sm:$0xff] (!%p316_p2), %vm364_vm0, %v2824_v14  ;;  %v2645_v23 = vpack.c.bf16 (!%p316_p2), %v509_v21, %v507_v20  ;;  %v508_v25 = vld [vmem:[%s3763_s1 + $0x70] sm:$0xff] (!%p316_p2)  ;;  %v511_v26 = vld [vmem:[%s3763_s1 + $0x88] sm:$0xff] (!%p316_p2) }
   0xe   : > { %374 = vst.msk [vmem:[#allocation2 + $0x48] sm:$0xff] (!%p316_p2), %vm364_vm0, %v2824_v14  ;;  %375 = vst.msk [vmem:[#allocation2 + $0x50] sm:$0xff] (!%p316_p2), %vm364_vm0, %v2824_v14  ;;  %v513_v27 = vld [vmem:[%s3763_s1 + $0x98] sm:$0xff] (!%p316_p2)  ;;  %v2997_v29 = vld [vmem:[%s3763_s1 + $0x80] sm:$0xff] (!%p316_p2)  ;;  %v2647_v34 = vpack.c.bf16 (!%p316_p2), %v508_v25, %v506_v24 }
   0xf   : > { %376 = vst.msk [vmem:[#allocation2 + $0x58] sm:$0xff] %vm364_vm0, %v2824_v14  ;;  %377 = vst.msk [vmem:[#allocation2 + $0x60] sm:$0xff] %vm364_vm0, %v2824_v14  ;;  %s3774_s22 = smov (!%p353_p3, %s2904_s22), 63  ;;  %2640 = vmatpush1.bf16.msra.mxu0 %v2639_v16  ;;  %v512_v30 = vld [vmem:[%s3763_s1 + $0x90] sm:$0xff]  ;;  %v515_v35 = vld [vmem:[%s3763_s1 + $0xa8] sm:$0xff]  ;;  %v2649_v40 = vpack.c.bf16 %v513_v27, %v511_v26  ;;  %s3776_s9 = smov (!%p359_p4, %s2435_s9), 3 }
  0x10   : > { %378 = vst.msk [vmem:[#allocation2 + $0x68] sm:$0xff] %vm364_vm0, %v2824_v14  ;;  %379 = vst.msk [vmem:[#allocation2 + $0x70] sm:$0xff] %vm364_vm0, %v2824_v14  ;;  %s2434_s23 = sshll.u32 %s3774_s22, 3  ;;  %2642 = vmatprep.subr.bf16.mxu0 %v2641_v17  ;;  %v517_v36 = vld [vmem:[%s3763_s1 + $0xb8] sm:$0xff]  ;;  %v514_v47 = vld [vmem:[%s3763_s1 + $0xa0] sm:$0xff]  ;;  %v2651_v52 = vpack.c.bf16 %v512_v30, %v2997_v29  ;;  %s361_s21 = scalar_lea.vmem %s3772_s10, %s3776_s9 }
  0x11   : > { %380 = vst.msk [vmem:[#allocation2 + $0x78] sm:$0xff] %vm364_vm0, %v2824_v14  ;;  %381 = vst.msk [vmem:[#allocation2 + $0x80] sm:$0xff] %vm364_vm0, %v2824_v14  ;;  %s2979_s30 = scalar_lea.vmem %s3762_s0, %s2434_s23  ;;  %v516_v48 = vld [vmem:[%s3763_s1 + $0xb0] sm:$0xff]  ;;  %v519_v53 = vld [vmem:[%s3763_s1 + $0xc8] sm:$0xff]  ;;  %v2653_v57 = vpack.c.bf16 %v517_v36, %v515_v35 }
  0x12   : > { %382 = vst.msk [vmem:[#allocation2 + $0x88] sm:$0xff] %vm364_vm0, %v2824_v14  ;;  %383 = vst.msk [vmem:[#allocation2 + $0x90] sm:$0xff] %vm364_vm0, %v2824_v14  ;;  %v397_v28 = vld [vmem:[%s2979_s30] sm:$0xff]  ;;  %v398_v31 = vld [vmem:[%s2979_s30 + $0x8] sm:$0xff]  ;;  %v2655_v0 = vpack.c.bf16 %v516_v48, %v514_v47 }
  0x13   : > { %384 = vst.msk [vmem:[#allocation2 + $0x98] sm:$0xff] %vm364_vm0, %v2824_v14  ;;  %385 = vst.msk [vmem:[#allocation2 + $0xa0] sm:$0xff] %vm364_vm0, %v2824_v14  ;;  %v399_v32 = vld [vmem:[%s2979_s30 + $0x10] sm:$0xff]  ;;  %v400_v33 = vld [vmem:[%s2979_s30 + $0x18] sm:$0xff]  ;;  %2644 = vmatpush1.bf16.msra.mxu0 %v2643_v22 }
  0x14   : > { %386 = vst.msk [vmem:[#allocation2 + $0xa8] sm:$0xff] %vm364_vm0, %v2824_v14  ;;  %387 = vst.msk [vmem:[#allocation2 + $0xb0] sm:$0xff] %vm364_vm0, %v2824_v14  ;;  %v401_v37 = vld [vmem:[%s2979_s30 + $0x20] sm:$0xff]  ;;  %v402_v38 = vld [vmem:[%s2979_s30 + $0x28] sm:$0xff]  ;;  %2646 = vmatprep.subr.bf16.mxu0 %v2645_v23 }
  0x15   : > { %388 = vst.msk [vmem:[#allocation2 + $0xb8] sm:$0xff] %vm364_vm0, %v2824_v14  ;;  %389 = vst.msk [vmem:[#allocation2 + $0xc0] sm:$0xff] %vm364_vm0, %v2824_v14  ;;  %v403_v39 = vld [vmem:[%s2979_s30 + $0x30] sm:$0xff]  ;;  %v404_v41 = vld [vmem:[%s2979_s30 + $0x38] sm:$0xff] }
  0x16   : > { %390 = vst.msk [vmem:[#allocation2 + $0xc8] sm:$0xff] %vm364_vm0, %v2824_v14  ;;  %391 = vst.msk [vmem:[#allocation2 + $0xd0] sm:$0xff] %vm364_vm0, %v2824_v14  ;;  %v405_v42 = vld [vmem:[%s2979_s30 + $0x40] sm:$0xff]  ;;  %v406_v43 = vld [vmem:[%s2979_s30 + $0x48] sm:$0xff] }
  0x17   : > { %392 = vst.msk [vmem:[#allocation2 + $0xd8] sm:$0xff] %vm364_vm0, %v2824_v14  ;;  %393 = vst.msk [vmem:[#allocation2 + $0xe0] sm:$0xff] %vm364_vm0, %v2824_v14  ;;  %v407_v44 = vld [vmem:[%s2979_s30 + $0x50] sm:$0xff]  ;;  %v408_v45 = vld [vmem:[%s2979_s30 + $0x58] sm:$0xff]  ;;  %2648 = vmatpush1.bf16.msra.mxu0 %v2647_v34 }
  0x18   : > { %394 = vst.msk [vmem:[#allocation2 + $0xe8] sm:$0xff] %vm364_vm0, %v2824_v14  ;;  %395 = vst.msk [vmem:[#allocation2 + $0xf0] sm:$0xff] %vm364_vm0, %v2824_v14  ;;  %v409_v46 = vld [vmem:[%s2979_s30 + $0x60] sm:$0xff]  ;;  %v410_v49 = vld [vmem:[%s2979_s30 + $0x68] sm:$0xff]  ;;  %2650 = vmatprep.subr.bf16.mxu0 %v2649_v40 }
  0x19   : > { %396 = vst.msk [vmem:[#allocation2 + $0xf8] sm:$0xff] %vm364_vm0, %v2824_v14  ;;  %v411_v50 = vld [vmem:[%s2979_s30 + $0x70] sm:$0xff]  ;;  %v412_v51 = vld [vmem:[%s2979_s30 + $0x78] sm:$0xff]  ;;  %v413_v54 = vld [vmem:[%s2979_s30 + $0x80] sm:$0xff] }
  0x1a   : > { %430 = vst.msk [vmem:[#allocation2] sm:$0xff] %vm429_vm1, %v397_v28  ;;  %431 = vst.msk [vmem:[#allocation2 + $0x8] sm:$0xff] %vm429_vm1, %v398_v31  ;;  %v414_v55 = vld [vmem:[%s2979_s30 + $0x88] sm:$0xff]  ;;  %v415_v56 = vld [vmem:[%s2979_s30 + $0x90] sm:$0xff] }
  0x1b   : > { %432 = vst.msk [vmem:[#allocation2 + $0x10] sm:$0xff] %vm429_vm1, %v399_v32  ;;  %433 = vst.msk [vmem:[#allocation2 + $0x18] sm:$0xff] %vm429_vm1, %v400_v33  ;;  %v416_v58 = vld [vmem:[%s2979_s30 + $0x98] sm:$0xff]  ;;  %v417_v59 = vld [vmem:[%s2979_s30 + $0xa0] sm:$0xff]  ;;  %2652 = vmatpush1.bf16.msra.mxu0 %v2651_v52 }
  0x1c   : > { %434 = vst.msk [vmem:[#allocation2 + $0x20] sm:$0xff] %vm429_vm1, %v401_v37  ;;  %435 = vst.msk [vmem:[#allocation2 + $0x28] sm:$0xff] %vm429_vm1, %v402_v38  ;;  %v418_v60 = vld [vmem:[%s2979_s30 + $0xa8] sm:$0xff]  ;;  %v521_v61 = vld [vmem:[%s3763_s1 + $0xd8] sm:$0xff]  ;;  %2654 = vmatprep.subr.bf16.mxu0 %v2653_v57 }
  0x1d   : > { %436 = vst.msk [vmem:[#allocation2 + $0x30] sm:$0xff] %vm429_vm1, %v403_v39  ;;  %437 = vst.msk [vmem:[#allocation2 + $0x38] sm:$0xff] %vm429_vm1, %v404_v41  ;;  %v419_v62 = vld [vmem:[%s2979_s30 + $0xb0] sm:$0xff]  ;;  %v420_v63 = vld [vmem:[%s2979_s30 + $0xb8] sm:$0xff]  ;;  %v2657_v1 = vpack.c.bf16 %v521_v61, %v519_v53 }
  0x1e   : > { %438 = vst.msk [vmem:[#allocation2 + $0x40] sm:$0xff] %vm429_vm1, %v405_v42  ;;  %439 = vst.msk [vmem:[#allocation2 + $0x48] sm:$0xff] %vm429_vm1, %v406_v43  ;;  %v518_v2 = vld [vmem:[%s3763_s1 + $0xc0] sm:$0xff]  ;;  %v520_v3 = vld [vmem:[%s3763_s1 + $0xd0] sm:$0xff] }
  0x1f   : > { %440 = vst.msk [vmem:[#allocation2 + $0x50] sm:$0xff] %vm429_vm1, %v407_v44  ;;  %441 = vst.msk [vmem:[#allocation2 + $0x58] sm:$0xff] %vm429_vm1, %v408_v45  ;;  %v523_v4 = vld [vmem:[%s3763_s1 + $0xe8] sm:$0xff]  ;;  %v525_v5 = vld [vmem:[%s3763_s1 + $0xf8] sm:$0xff]  ;;  %2656 = vmatpush1.bf16.msra.mxu0 %v2655_v0  ;;  %v2659_v6 = vpack.c.bf16 %v520_v3, %v518_v2 }
  0x20   : > { %442 = vst.msk [vmem:[#allocation2 + $0x60] sm:$0xff] %vm429_vm1, %v409_v46  ;;  %443 = vst.msk [vmem:[#allocation2 + $0x68] sm:$0xff] %vm429_vm1, %v410_v49  ;;  %2658 = vmatprep.subr.bf16.mxu0 %v2657_v1  ;;  %v2661_v7 = vpack.c.bf16 %v525_v5, %v523_v4  ;;  %v522_v9 = vld [vmem:[%s3763_s1 + $0xe0] sm:$0xff]  ;;  %v524_v10 = vld [vmem:[%s3763_s1 + $0xf0] sm:$0xff] }
  0x21   : > { %444 = vst.msk [vmem:[#allocation2 + $0x70] sm:$0xff] %vm429_vm1, %v411_v50  ;;  %445 = vst.msk [vmem:[#allocation2 + $0x78] sm:$0xff] %vm429_vm1, %v412_v51  ;;  %v421_v11 = vld [vmem:[%s2979_s30 + $0xc0] sm:$0xff]  ;;  %v422_v12 = vld [vmem:[%s2979_s30 + $0xc8] sm:$0xff]  ;;  %v2663_v15 = vpack.c.bf16 %v524_v10, %v522_v9 }
  0x22   : > { %446 = vst.msk [vmem:[#allocation2 + $0x80] sm:$0xff] %vm429_vm1, %v413_v54  ;;  %447 = vst.msk [vmem:[#allocation2 + $0x88] sm:$0xff] %vm429_vm1, %v414_v55  ;;  %v423_v13 = vld [vmem:[%s2979_s30 + $0xd0] sm:$0xff]  ;;  %v424_v14 = vld [vmem:[%s2979_s30 + $0xd8] sm:$0xff] }
  0x23   : > { %448 = vst.msk [vmem:[#allocation2 + $0x90] sm:$0xff] %vm429_vm1, %v415_v56  ;;  %449 = vst.msk [vmem:[#allocation2 + $0x98] sm:$0xff] %vm429_vm1, %v416_v58  ;;  %2660 = vmatpush1.bf16.msra.mxu0 %v2659_v6  ;;  %v425_v16 = vld [vmem:[%s2979_s30 + $0xe0] sm:$0xff]  ;;  %v426_v17 = vld [vmem:[%s2979_s30 + $0xe8] sm:$0xff] }
  0x24   : > { %450 = vst.msk [vmem:[#allocation2 + $0xa0] sm:$0xff] %vm429_vm1, %v417_v59  ;;  %451 = vst.msk [vmem:[#allocation2 + $0xa8] sm:$0xff] %vm429_vm1, %v418_v60  ;;  %v427_v18 = vld [vmem:[%s2979_s30 + $0xf0] sm:$0xff]  ;;  %2662 = vmatprep.subr.bf16.mxu0 %v2661_v7  ;;  %v428_v19 = vld [vmem:[%s2979_s30 + $0xf8] sm:$0xff] }
  0x25   : > { %452 = vst.msk [vmem:[#allocation2 + $0xb0] sm:$0xff] %vm429_vm1, %v419_v62  ;;  %453 = vst.msk [vmem:[#allocation2 + $0xb8] sm:$0xff] %vm429_vm1, %v420_v63  ;;  %v2695_v20 = vld [vmem:[%s3764_s2 + $0x4] ss:$8 sps:$4 sm:$0xff]   ;;  %v2697_v21 = vld [vmem:[%s3764_s2] ss:$8 sps:$4 sm:$0xff]  }
  0x26   : > { %454 = vst.msk [vmem:[#allocation2 + $0xc0] sm:$0xff] %vm429_vm1, %v421_v11  ;;  %455 = vst.msk [vmem:[#allocation2 + $0xc8] sm:$0xff] %vm429_vm1, %v422_v12  ;;  %v2698_v22 = vld [vmem:[%s3764_s2 + $0x14] ss:$8 sps:$4 sm:$0xff]   ;;  %v462_v23 = vld [vmem:[#allocation2] sm:$0xff]  ;;  %1051 = vmatprep.subr.bf16.mxu1 %v2695_v20 }
  0x27   : > { %456 = vst.msk [vmem:[#allocation2 + $0xd0] sm:$0xff] %vm429_vm1, %v423_v13  ;;  %457 = vst.msk [vmem:[#allocation2 + $0xd8] sm:$0xff] %vm429_vm1, %v424_v14  ;;  %2664 = vmatpush1.bf16.msra.mxu0 %v2663_v15  ;;  %1052 = vmatpush1.bf16.msra.mxu1 %v2697_v21  ;;  %v2700_v24 = vld [vmem:[%s3764_s2 + $0x10] ss:$8 sps:$4 sm:$0xff]   ;;  %v2701_v25 = vld [vmem:[%s3764_s2 + $0x24] ss:$8 sps:$4 sm:$0xff]  }
  0x28   : > { %458 = vst.msk [vmem:[#allocation2 + $0xe0] sm:$0xff] %vm429_vm1, %v425_v16  ;;  %459 = vst.msk [vmem:[#allocation2 + $0xe8] sm:$0xff] %vm429_vm1, %v426_v17  ;;  %1053 = vmatprep.subr.bf16.mxu1 %v2698_v22  ;;  %v463_v26 = vld [vmem:[#allocation2 + $0x8] sm:$0xff]  ;;  %v2704_v28 = vld [vmem:[%s3764_s2 + $0x34] ss:$8 sps:$4 sm:$0xff]   ;;  %v2825_v13 = vmov 0  }
  0x29   : > { %460 = vst.msk [vmem:[#allocation2 + $0xf0] sm:$0xff] %vm429_vm1, %v427_v18  ;;  %461 = vst.msk [vmem:[#allocation2 + $0xf8] sm:$0xff] %vm429_vm1, %v428_v19  ;;  %v2703_v27 = vld [vmem:[%s3764_s2 + $0x20] ss:$8 sps:$4 sm:$0xff]   ;;  %v464_v29 = vld [vmem:[#allocation2 + $0x10] sm:$0xff]  ;;  %2693 = vset.pattern.permute.xlu0 %v2825_v13  ;;  %2694 = vset.pattern.permute.xlu1 %v2825_v13 }
  0x2a   : > { %591 = vmatmul.mubr.f32.vlgmr.msra.gmra.mrb[0].mxu0 %v462_v23  ;;  %v2706_v30 = vld [vmem:[%s3764_s2 + $0x30] ss:$8 sps:$4 sm:$0xff]   ;;  %v2707_v31 = vld [vmem:[%s3764_s2 + $0x44] ss:$8 sps:$4 sm:$0xff]   ;;  %v2709_v33 = vld [vmem:[%s3764_s2 + $0x40] ss:$8 sps:$4 sm:$0xff]  }
  0x2b   : > { %596 = vmatprep.mubr.f32.mxu0 %v2823_v8  ;;  %1054 = vmatpush1.bf16.msra.mxu1 %v2700_v24  ;;  %v465_v32 = vld [vmem:[#allocation2 + $0x18] sm:$0xff]  ;;  %v466_v35 = vld [vmem:[#allocation2 + $0x20] sm:$0xff]  ;;  %v467_v37 = vld [vmem:[#allocation2 + $0x28] sm:$0xff] }
  0x2c   : > { %1055 = vmatprep.subr.bf16.mxu1 %v2701_v25  ;;  %v2710_v34 = vld [vmem:[%s3764_s2 + $0x54] ss:$8 sps:$4 sm:$0xff]   ;;  %v2712_v36 = vld [vmem:[%s3764_s2 + $0x50] ss:$8 sps:$4 sm:$0xff]   ;;  %v2713_v38 = vld [vmem:[%s3764_s2 + $0x64] ss:$8 sps:$4 sm:$0xff]  }
  0x2d   : > { %v2715_v39 = vld [vmem:[%s3764_s2 + $0x60] ss:$8 sps:$4 sm:$0xff]   ;;  %v2716_v40 = vld [vmem:[%s3764_s2 + $0x74] ss:$8 sps:$4 sm:$0xff]   ;;  %v2718_v42 = vld [vmem:[%s3764_s2 + $0x70] ss:$8 sps:$4 sm:$0xff]  }
  0x2e   : > { %597 = vmatmul.mubr.f32.gmra.mrb[2].mxu0 %v463_v26  ;;  %v468_v41 = vld [vmem:[#allocation2 + $0x30] sm:$0xff]  ;;  %v2719_v43 = vld [vmem:[%s3764_s2 + $0x84] ss:$8 sps:$4 sm:$0xff]   ;;  %v469_v44 = vld [vmem:[#allocation2 + $0x38] sm:$0xff] }
  0x2f   : > { %602 = vmatprep.mubr.f32.mxu0 %v2823_v8  ;;  %1056 = vmatpush1.bf16.msra.mxu1 %v2703_v27  ;;  %v2721_v45 = vld [vmem:[%s3764_s2 + $0x80] ss:$8 sps:$4 sm:$0xff]   ;;  %v2722_v46 = vld [vmem:[%s3764_s2 + $0x94] ss:$8 sps:$4 sm:$0xff]   ;;  %v2724_v48 = vld [vmem:[%s3764_s2 + $0x90] ss:$8 sps:$4 sm:$0xff]  }
  0x30   : > { %1057 = vmatprep.subr.bf16.mxu1 %v2704_v28  ;;  %v470_v47 = vld [vmem:[#allocation2 + $0x40] sm:$0xff]  ;;  %v471_v50 = vld [vmem:[#allocation2 + $0x48] sm:$0xff]  ;;  %v2728_v52 = vld [vmem:[%s3764_s2 + $0xb4] ss:$8 sps:$4 sm:$0xff]  }
  0x31   : > { %v2725_v49 = vld [vmem:[%s3764_s2 + $0xa4] ss:$8 sps:$4 sm:$0xff]   ;;  %v2727_v51 = vld [vmem:[%s3764_s2 + $0xa0] ss:$8 sps:$4 sm:$0xff]   ;;  %v472_v53 = vld [vmem:[#allocation2 + $0x50] sm:$0xff] }
  0x32   : > { %603 = vmatmul.mubr.f32.gmra.mrb[4].mxu0 %v464_v29  ;;  %v2730_v54 = vld [vmem:[%s3764_s2 + $0xb0] ss:$8 sps:$4 sm:$0xff]   ;;  %v2731_v55 = vld [vmem:[%s3764_s2 + $0xc4] ss:$8 sps:$4 sm:$0xff]   ;;  %v2733_v57 = vld [vmem:[%s3764_s2 + $0xc0] ss:$8 sps:$4 sm:$0xff]  }
  0x33   : > { %608 = vmatprep.mubr.f32.mxu0 %v2823_v8  ;;  %1058 = vmatpush1.bf16.msra.mxu1 %v2706_v30  ;;  %v473_v56 = vld [vmem:[#allocation2 + $0x58] sm:$0xff]  ;;  %v474_v59 = vld [vmem:[#allocation2 + $0x60] sm:$0xff]  ;;  %v475_v60 = vld [vmem:[#allocation2 + $0x68] sm:$0xff] }
  0x34   : > { %1059 = vmatprep.subr.bf16.mxu1 %v2707_v31  ;;  %v2734_v58 = vld [vmem:[%s3764_s2 + $0xd4] ss:$8 sps:$4 sm:$0xff]   ;;  %v478_v63 = vld [vmem:[#allocation2 + $0x80] sm:$0xff]  ;;  %v479_v0 = vld [vmem:[#allocation2 + $0x88] sm:$0xff] }
  0x35   : > { %v476_v61 = vld [vmem:[#allocation2 + $0x70] sm:$0xff]  ;;  %v477_v62 = vld [vmem:[#allocation2 + $0x78] sm:$0xff]  ;;  %v482_v3 = vld [vmem:[#allocation2 + $0xa0] sm:$0xff] }
  0x36   : > { %609 = vmatmul.mubr.f32.gmra.mrb[6].mxu0 %v465_v32  ;;  %v480_v1 = vld [vmem:[#allocation2 + $0x90] sm:$0xff]  ;;  %v481_v2 = vld [vmem:[#allocation2 + $0x98] sm:$0xff]  ;;  %v483_v4 = vld [vmem:[#allocation2 + $0xa8] sm:$0xff] }
  0x37   : > { %614 = vmatprep.mubr.f32.mxu0 %v2823_v8  ;;  %1060 = vmatpush1.bf16.msra.mxu1 %v2709_v33  ;;  %v2736_v5 = vld [vmem:[%s3764_s2 + $0xd0] ss:$8 sps:$4 sm:$0xff]   ;;  %v2737_v6 = vld [vmem:[%s3764_s2 + $0xe4] ss:$8 sps:$4 sm:$0xff]   ;;  %v2739_v9 = vld [vmem:[%s3764_s2 + $0xe0] ss:$8 sps:$4 sm:$0xff]  }
  0x38   : > { %1061 = vmatprep.subr.bf16.mxu1 %v2710_v34  ;;  %v484_v7 = vld [vmem:[#allocation2 + $0xb0] sm:$0xff]  ;;  %v485_v11 = vld [vmem:[#allocation2 + $0xb8] sm:$0xff]  ;;  %v486_v14 = vld [vmem:[#allocation2 + $0xc0] sm:$0xff] }
  0x39   : > { %v2740_v10 = vld [vmem:[%s3764_s2 + $0xf4] ss:$8 sps:$4 sm:$0xff]   ;;  %v2742_v12 = vld [vmem:[%s3764_s2 + $0xf0] ss:$8 sps:$4 sm:$0xff]   ;;  %v487_v15 = vld [vmem:[#allocation2 + $0xc8] sm:$0xff] }
  0x3a   : > { %615 = vmatmul.mubr.f32.gmra.mrb[8].mxu0 %v466_v35  ;;  %v488_v16 = vld [vmem:[#allocation2 + $0xd0] sm:$0xff]  ;;  %v489_v17 = vld [vmem:[#allocation2 + $0xd8] sm:$0xff]  ;;  %v490_v18 = vld [vmem:[#allocation2 + $0xe0] sm:$0xff] }
  0x3b   : > { %620 = vmatprep.mubr.f32.mxu0 %v2823_v8  ;;  %1062 = vmatpush1.bf16.msra.mxu1 %v2712_v36  ;;  %v491_v19 = vld [vmem:[#allocation2 + $0xe8] sm:$0xff]  ;;  %v492_v20 = vld [vmem:[#allocation2 + $0xf0] sm:$0xff]  ;;  %v493_v21 = vld [vmem:[#allocation2 + $0xf8] sm:$0xff] }
  0x3c   : > { %1063 = vmatprep.subr.bf16.mxu1 %v2713_v38  ;;  %v2743_v22 = vld [vmem:[%s3766_s4] ss:$8 sps:$4 sm:$0xff]   ;;  %v2745_v23 = vld [vmem:[%s3766_s4 + $0x4] ss:$8 sps:$4 sm:$0xff]   ;;  %v2746_v24 = vld [vmem:[%s3766_s4 + $0x10] ss:$8 sps:$4 sm:$0xff]  }
  0x3d   : > { %1512 = vmatprep.subr.bf16.mxu0 %v2745_v23  ;;  %v2749_v25 = vld [vmem:[%s3766_s4 + $0x20] ss:$8 sps:$4 sm:$0xff]   ;;  %v2751_v26 = vld [vmem:[%s3766_s4 + $0x24] ss:$8 sps:$4 sm:$0xff]   ;;  %v2752_v28 = vld [vmem:[%s3766_s4 + $0x30] ss:$8 sps:$4 sm:$0xff]  }
  0x3e   : > { %621 = vmatmul.mubr.f32.gmra.mrb[10].mxu0 %v467_v37  ;;  %v2754_v29 = vld [vmem:[%s3766_s4 + $0x34] ss:$8 sps:$4 sm:$0xff]   ;;  %v2755_v31 = vld [vmem:[%s3766_s4 + $0x40] ss:$8 sps:$4 sm:$0xff]   ;;  %v2757_v32 = vld [vmem:[%s3766_s4 + $0x44] ss:$8 sps:$4 sm:$0xff]  }
  0x3f   : > { %626 = vmatprep.mubr.f32.mxu0 %v2823_v8  ;;  %1064 = vmatpush1.bf16.msra.mxu1 %v2715_v39  ;;  %v2760_v34 = vld [vmem:[%s3766_s4 + $0x54] ss:$8 sps:$4 sm:$0xff]   ;;  %v2758_v38 = vld [vmem:[%s3766_s4 + $0x50] ss:$8 sps:$4 sm:$0xff]  }
  0x40   : > { %1065 = vmatprep.subr.bf16.mxu1 %v2716_v40  ;;  %1513 = vmatpush1.bf16.msra.mxu0 %v2743_v22 }
  0x42   : > { %627 = vmatmul.mubr.f32.gmra.mrb[12].mxu0 %v468_v41  ;;  %v2763_v41 = vld [vmem:[%s3766_s4 + $0x64] ss:$8 sps:$4 sm:$0xff]  }
  0x43   : > { %632 = vmatprep.mubr.f32.mxu0 %v2823_v8  ;;  %1066 = vmatpush1.bf16.msra.mxu1 %v2718_v42 }
  0x44   : > { %1067 = vmatprep.subr.bf16.mxu1 %v2719_v43 }
  0x46   : > { %633 = vmatmul.mubr.f32.gmra.mrb[14].mxu0 %v469_v44  ;;  %v2761_v44 = vld [vmem:[%s3766_s4 + $0x60] ss:$8 sps:$4 sm:$0xff]  }
  0x47   : > { %638 = vmatprep.mubr.f32.mxu0 %v2823_v8  ;;  %1068 = vmatpush1.bf16.msra.mxu1 %v2721_v45 }
  0x48   : > { %1069 = vmatprep.subr.bf16.mxu1 %v2722_v46  ;;  %v2766_v46 = vld [vmem:[%s3766_s4 + $0x74] ss:$8 sps:$4 sm:$0xff]  }
  0x4a   : > { %639 = vmatmul.mubr.f32.gmra.mrb[16].mxu0 %v470_v47 }
  0x4b   : > { %644 = vmatprep.mubr.f32.mxu0 %v2823_v8  ;;  %1070 = vmatpush1.bf16.msra.mxu1 %v2724_v48 }
  0x4c   : > { %1071 = vmatprep.subr.bf16.mxu1 %v2725_v49 }
  0x4e   : > { %645 = vmatmul.mubr.f32.gmra.mrb[18].mxu0 %v471_v50  ;;  %v2764_v50 = vld [vmem:[%s3766_s4 + $0x70] ss:$8 sps:$4 sm:$0xff]  }
  0x4f   : > { %650 = vmatprep.mubr.f32.mxu0 %v2823_v8  ;;  %1072 = vmatpush1.bf16.msra.mxu1 %v2727_v51 }
  0x50   : > { %1073 = vmatprep.subr.bf16.mxu1 %v2728_v52 }
  0x52   : > { %651 = vmatmul.mubr.f32.gmra.mrb[20].mxu0 %v472_v53  ;;  %v2769_v53 = vld [vmem:[%s3766_s4 + $0x84] ss:$8 sps:$4 sm:$0xff]  }
  0x53   : > { %656 = vmatprep.mubr.f32.mxu0 %v2823_v8  ;;  %1074 = vmatpush1.bf16.msra.mxu1 %v2730_v54 }
  0x54   : > { %1075 = vmatprep.subr.bf16.mxu1 %v2731_v55 }
  0x56   : > { %657 = vmatmul.mubr.f32.gmra.mrb[22].mxu0 %v473_v56  ;;  %v2767_v56 = vld [vmem:[%s3766_s4 + $0x80] ss:$8 sps:$4 sm:$0xff]  }
  0x57   : > { %662 = vmatprep.mubr.f32.mxu0 %v2823_v8  ;;  %1076 = vmatpush1.bf16.msra.mxu1 %v2733_v57 }
  0x58   : > { %1077 = vmatprep.subr.bf16.mxu1 %v2734_v58  ;;  %v2772_v58 = vld [vmem:[%s3766_s4 + $0x94] ss:$8 sps:$4 sm:$0xff]  }
  0x5a   : > { %663 = vmatmul.mubr.f32.gmra.mrb[24].mxu0 %v474_v59 }
  0x5b   : > { %668 = vmatprep.mubr.f32.mxu0 %v2823_v8  ;;  %1078 = vmatpush1.bf16.msra.mxu1 %v2736_v5 }
  0x5c   : > { %1079 = vmatprep.subr.bf16.mxu1 %v2737_v6  ;;  %v2778_v6 = vld [vmem:[%s3766_s4 + $0xb4] ss:$8 sps:$4 sm:$0xff]  }
  0x5e   : > { %669 = vmatmul.mubr.f32.gmra.mrb[26].mxu0 %v475_v60 }
  0x5f   : > { %674 = vmatprep.mubr.f32.mxu0 %v2823_v8  ;;  %1080 = vmatpush1.bf16.msra.mxu1 %v2739_v9 }
  0x60   : > { %1081 = vmatprep.subr.bf16.mxu1 %v2740_v10 }
  0x62   : > { %675 = vmatmul.mubr.f32.gmra.mrb[28].mxu0 %v476_v61 }
  0x63   : > { %680 = vmatprep.mubr.f32.mxu0 %v2823_v8  ;;  %1082 = vmatpush1.bf16.msra.mxu1 %v2742_v12 }
  0x66   : > { %681 = vmatmul.mubr.f32.gmra.mrb[30].mxu0 %v477_v62  ;;  %v2770_v62 = vld [vmem:[%s3766_s4 + $0x90] ss:$8 sps:$4 sm:$0xff]  }
  0x67   : > { %686 = vmatprep.mubr.f32.mxu0 %v2823_v8 }
  0x6a   : > { %687 = vmatmul.mubr.f32.gmra.mrb[32].mxu0 %v478_v63 }
  0x6b   : > { %692 = vmatprep.mubr.f32.mxu0 %v2823_v8 }
  0x6e   : > { %693 = vmatmul.mubr.f32.gmra.mrb[34].mxu0 %v479_v0 }
  0x6f   : > { %698 = vmatprep.mubr.f32.mxu0 %v2823_v8 }
  0x72   : > { %699 = vmatmul.mubr.f32.gmra.mrb[36].mxu0 %v480_v1  ;;  %v2775_v1 = vld [vmem:[%s3766_s4 + $0xa4] ss:$8 sps:$4 sm:$0xff]  }
  0x73   : > { %704 = vmatprep.mubr.f32.mxu0 %v2823_v8 }
  0x76   : > { %705 = vmatmul.mubr.f32.gmra.mrb[38].mxu0 %v481_v2 }
  0x77   : > { %710 = vmatprep.mubr.f32.mxu0 %v2823_v8 }
  0x7a   : > { %711 = vmatmul.mubr.f32.gmra.mrb[40].mxu0 %v482_v3 }
  0x7b   : > { %716 = vmatprep.mubr.f32.mxu0 %v2823_v8 }
  0x7e   : > { %717 = vmatmul.mubr.f32.gmra.mrb[42].mxu0 %v483_v4  ;;  %v2773_v4 = vld [vmem:[%s3766_s4 + $0xa0] ss:$8 sps:$4 sm:$0xff]  }
  0x7f   : > { %722 = vmatprep.mubr.f32.mxu0 %v2823_v8 }
  0x82   : > { %723 = vmatmul.mubr.f32.gmra.mrb[44].mxu0 %v484_v7 }
  0x83   : > { %728 = vmatprep.mubr.f32.mxu0 %v2823_v8 }
  0x86   : > { %729 = vmatmul.mubr.f32.gmra.mrb[46].mxu0 %v485_v11  ;;  %v2776_v11 = vld [vmem:[%s3766_s4 + $0xb0] ss:$8 sps:$4 sm:$0xff]  }
  0x87   : > { %734 = vmatprep.mubr.f32.mxu0 %v2823_v8 }
  0x8a   : > { %735 = vmatmul.mubr.f32.gmra.mrb[48].mxu0 %v486_v14 }
  0x8b   : > { %740 = vmatprep.mubr.f32.mxu0 %v2823_v8 }
  0x8e   : > { %741 = vmatmul.mubr.f32.gmra.mrb[50].mxu0 %v487_v15  ;;  %v2781_v15 = vld [vmem:[%s3766_s4 + $0xc4] ss:$8 sps:$4 sm:$0xff]  }
  0x8f   : > { %746 = vmatprep.mubr.f32.mxu0 %v2823_v8 }
  0x92   : > { %747 = vmatmul.mubr.f32.gmra.mrb[52].mxu0 %v488_v16 }
  0x93   : > { %752 = vmatprep.mubr.f32.mxu0 %v2823_v8 }
  0x96   : > { %753 = vmatmul.mubr.f32.gmra.mrb[54].mxu0 %v489_v17 }
  0x97   : > { %758 = vmatprep.mubr.f32.mxu0 %v2823_v8 }
  0x9a   : > { %759 = vmatmul.mubr.f32.gmra.mrb[56].mxu0 %v490_v18  ;;  %v2779_v18 = vld [vmem:[%s3766_s4 + $0xc0] ss:$8 sps:$4 sm:$0xff]  }
  0x9b   : > { %764 = vmatprep.mubr.f32.mxu0 %v2823_v8 }
  0x9e   : > { %765 = vmatmul.mubr.f32.gmra.mrb[58].mxu0 %v491_v19 }
  0x9f   : > { %770 = vmatprep.mubr.f32.mxu0 %v2823_v8 }
  0xa2   : > { %771 = vmatmul.mubr.f32.gmra.mrb[60].mxu0 %v492_v20  ;;  %v2784_v20 = vld [vmem:[%s3766_s4 + $0xd4] ss:$8 sps:$4 sm:$0xff]  }
  0xa3   : > { %776 = vmatprep.mubr.f32.mxu0 %v2823_v8  ;;  %v2748_v8 = vld [vmem:[%s3766_s4 + $0x14] ss:$8 sps:$4 sm:$0xff]  }
  0xa4   : > { %1514 = vmatprep.subr.bf16.mxu0 %v2748_v8 }
  0xa5   : > { %1515 = vmatpush1.bf16.msra.mxu0 %v2746_v24  ;;  %v2782_v24 = vld [vmem:[%s3766_s4 + $0xd0] ss:$8 sps:$4 sm:$0xff]  }
  0xa6   : > { %777 = vmatmul.mubr.f32.gmra.mrb[62].mxu0 %v493_v21  ;;  %1516 = vmatprep.subr.bf16.mxu0 %v2751_v26  ;;  %v2787_v26 = vld [vmem:[%s3766_s4 + $0xe4] ss:$8 sps:$4 sm:$0xff]  }
  0xa9   : > { %1517 = vmatpush1.bf16.msra.mxu0 %v2749_v25 }
  0xaa   : > { %1518 = vmatprep.subr.bf16.mxu0 %v2754_v29  ;;  %v2785_v29 = vld [vmem:[%s3766_s4 + $0xe0] ss:$8 sps:$4 sm:$0xff]  }
  0xad   : > { %1519 = vmatpush1.bf16.msra.mxu0 %v2752_v28 }
  0xae   : > { %1520 = vmatprep.subr.bf16.mxu0 %v2757_v32 }
  0xb1   : > { %1521 = vmatpush1.bf16.msra.mxu0 %v2755_v31 }
  0xb2   : > { %1522 = vmatprep.subr.bf16.mxu0 %v2760_v34 }
  0xb5   : > { %1523 = vmatpush1.bf16.msra.mxu0 %v2758_v38 }
  0xb6   : > { %1524 = vmatprep.subr.bf16.mxu0 %v2763_v41 }
  0xb9   : > { %1525 = vmatpush1.bf16.msra.mxu0 %v2761_v44 }
  0xba   : > { %1526 = vmatprep.subr.bf16.mxu0 %v2766_v46 }
  0xbd   : > { %1527 = vmatpush1.bf16.msra.mxu0 %v2764_v50 }
  0xbe   : > { %1528 = vmatprep.subr.bf16.mxu0 %v2769_v53 }
  0xc1   : > { %1529 = vmatpush1.bf16.msra.mxu0 %v2767_v56 }
  0xc2   : > { %1530 = vmatprep.subr.bf16.mxu0 %v2772_v58 }
  0xc5   : > { %1531 = vmatpush1.bf16.msra.mxu0 %v2770_v62 }
  0xc6   : > { %1532 = vmatprep.subr.bf16.mxu0 %v2775_v1 }
  0xc9   : > { %1533 = vmatpush1.bf16.msra.mxu0 %v2773_v4 }
  0xca   : > { %1534 = vmatprep.subr.bf16.mxu0 %v2778_v6 }
  0xcd   : > { %1535 = vmatpush1.bf16.msra.mxu0 %v2776_v11 }
  0xce   : > { %1536 = vmatprep.subr.bf16.mxu0 %v2781_v15 }
  0xd1   : > { %1537 = vmatpush1.bf16.msra.mxu0 %v2779_v18 }
  0xd2   : > { %1538 = vmatprep.subr.bf16.mxu0 %v2784_v20 }
  0xd5   : > { %1539 = vmatpush1.bf16.msra.mxu0 %v2782_v24  ;;  %v2790_v24 = vld [vmem:[%s3766_s4 + $0xf4] ss:$8 sps:$4 sm:$0xff]  }
  0xd6   : > { %1540 = vmatprep.subr.bf16.mxu0 %v2787_v26 }
  0xd9   : > { %1541 = vmatpush1.bf16.msra.mxu0 %v2785_v29 }
  0xda   : > { %1542 = vmatprep.subr.bf16.mxu0 %v2790_v24 }
  0xfd   : > { %v592_v27 = vpop.f32.mrb[0].mxu0 }
  0xfe   : > { %v594_v30 = vpop.f32.mrb[1].mxu0 }
 0x101   : > { %v598_v33 = vpop.f32.mrb[2].mxu0 }
 0x102   : > { %v783_v35 = vpack.c.bf16 %v598_v33, %v592_v27  ;;  %v600_v36 = vpop.f32.mrb[3].mxu0 }
 0x103   : > { %v784_v37 = vpack.c.bf16 %v600_v36, %v594_v30 }
 0x104   : > { %v815_v42 = vmax.bf16 %v2825_v13, %v783_v35 }
 0x105   : > { %v604_v39 = vpop.f32.mrb[4].mxu0  ;;  %v816_v40 = vmax.bf16 %v2825_v13, %v784_v37 }
 0x106   : > { %v606_v43 = vpop.f32.mrb[5].mxu0 }
 0x107   : > { %1083 = vmatprep.mubr.bf16.mxu1 %v816_v40 }
 0x108   : > { %1084 = vmatmul.mubr.bf16.vlgmr.msra.gmra.mrb[0].mxu1 %v815_v42 }
 0x109   : > { %v610_v45 = vpop.f32.mrb[6].mxu0 }
 0x10a   : > { %v785_v47 = vpack.c.bf16 %v610_v45, %v604_v39  ;;  %v612_v48 = vpop.f32.mrb[7].mxu0 }
 0x10b   : > { %v786_v49 = vpack.c.bf16 %v612_v48, %v606_v43 }
 0x10c   : > { %v817_v54 = vmax.bf16 %v2825_v13, %v785_v47 }
 0x10d   : > { %v818_v51 = vmax.bf16 %v2825_v13, %v786_v49  ;;  %v616_v52 = vpop.f32.mrb[8].mxu0 }
 0x10e   : > { %v618_v55 = vpop.f32.mrb[9].mxu0 }
 0x10f   : > { %1093 = vmatprep.mubr.bf16.mxu1 %v818_v51 }
 0x110   : > { %1094 = vmatmul.mubr.bf16.gmra.mrb[4].mxu1 %v817_v54 }
 0x111   : > { %v622_v57 = vpop.f32.mrb[10].mxu0 }
 0x112   : > { %v787_v59 = vpack.c.bf16 %v622_v57, %v616_v52  ;;  %v624_v60 = vpop.f32.mrb[11].mxu0 }
 0x113   : > { %v788_v61 = vpack.c.bf16 %v624_v60, %v618_v55 }
 0x114   : > { %v819_v2 = vmax.bf16 %v2825_v13, %v787_v59 }
 0x115   : > { %v820_v63 = vmax.bf16 %v2825_v13, %v788_v61  ;;  %v628_v0 = vpop.f32.mrb[12].mxu0 }
 0x116   : > { %v630_v3 = vpop.f32.mrb[13].mxu0 }
 0x117   : > { %1103 = vmatprep.mubr.bf16.mxu1 %v820_v63 }
 0x118   : > { %1104 = vmatmul.mubr.bf16.gmra.mrb[8].mxu1 %v819_v2 }
 0x119   : > { %v634_v5 = vpop.f32.mrb[14].mxu0 }
 0x11a   : > { %v789_v7 = vpack.c.bf16 %v634_v5, %v628_v0  ;;  %v636_v9 = vpop.f32.mrb[15].mxu0 }
 0x11b   : > { %v790_v10 = vpack.c.bf16 %v636_v9, %v630_v3 }
 0x11c   : > { %v821_v16 = vmax.bf16 %v2825_v13, %v789_v7 }
 0x11d   : > { %v822_v12 = vmax.bf16 %v2825_v13, %v790_v10  ;;  %v640_v14 = vpop.f32.mrb[16].mxu0 }
 0x11e   : > { %v642_v17 = vpop.f32.mrb[17].mxu0 }
 0x11f   : > { %1113 = vmatprep.mubr.bf16.mxu1 %v822_v12 }
 0x120   : > { %1114 = vmatmul.mubr.bf16.gmra.mrb[12].mxu1 %v821_v16 }
 0x121   : > { %v646_v19 = vpop.f32.mrb[18].mxu0 }
 0x122   : > { %v791_v21 = vpack.c.bf16 %v646_v19, %v640_v14  ;;  %v648_v22 = vpop.f32.mrb[19].mxu0 }
 0x123   : > { %v792_v23 = vpack.c.bf16 %v648_v22, %v642_v17 }
 0x124   : > { %v823_v27 = vmax.bf16 %v2825_v13, %v791_v21 }
 0x125   : > { %v824_v8 = vmax.bf16 %v2825_v13, %v792_v23  ;;  %v652_v25 = vpop.f32.mrb[20].mxu0 }
 0x126   : > { %v654_v28 = vpop.f32.mrb[21].mxu0 }
 0x127   : > { %1123 = vmatprep.mubr.bf16.mxu1 %v824_v8 }
 0x128   : > { %1124 = vmatmul.mubr.bf16.gmra.mrb[16].mxu1 %v823_v27 }
 0x129   : > { %v658_v30 = vpop.f32.mrb[22].mxu0 }
 0x12a   : > { %v793_v31 = vpack.c.bf16 %v658_v30, %v652_v25  ;;  %v660_v32 = vpop.f32.mrb[23].mxu0  ;;  %v2788_v25 = vld [vmem:[%s3766_s4 + $0xf0] ss:$8 sps:$4 sm:$0xff]  }
 0x12b   : > { %v794_v33 = vpack.c.bf16 %v660_v32, %v654_v28  ;;  %1543 = vmatpush1.bf16.msra.mxu0 %v2788_v25 }
 0x12c   : > { %v825_v36 = vmax.bf16 %v2825_v13, %v793_v31 }
 0x12d   : > { %v826_v34 = vmax.bf16 %v2825_v13, %v794_v33  ;;  %v664_v35 = vpop.f32.mrb[24].mxu0 }
 0x12e   : > { %v666_v37 = vpop.f32.mrb[25].mxu0 }
 0x12f   : > { %1133 = vmatprep.mubr.bf16.mxu1 %v826_v34 }
 0x130   : > { %1134 = vmatmul.mubr.bf16.gmra.mrb[20].mxu1 %v825_v36 }
 0x131   : > { %v670_v38 = vpop.f32.mrb[26].mxu0 }
 0x132   : > { %v795_v39 = vpack.c.bf16 %v670_v38, %v664_v35  ;;  %v672_v40 = vpop.f32.mrb[27].mxu0 }
 0x133   : > { %v796_v41 = vpack.c.bf16 %v672_v40, %v666_v37 }
 0x134   : > { %v827_v44 = vmax.bf16 %v2825_v13, %v795_v39 }
 0x135   : > { %v828_v42 = vmax.bf16 %v2825_v13, %v796_v41  ;;  %v676_v43 = vpop.f32.mrb[28].mxu0 }
 0x136   : > { %v678_v45 = vpop.f32.mrb[29].mxu0 }
 0x137   : > { %1143 = vmatprep.mubr.bf16.mxu1 %v828_v42 }
 0x138   : > { %1144 = vmatmul.mubr.bf16.gmra.mrb[24].mxu1 %v827_v44 }
 0x139   : > { %v682_v46 = vpop.f32.mrb[30].mxu0 }
 0x13a   : > { %v797_v47 = vpack.c.bf16 %v682_v46, %v676_v43  ;;  %v684_v48 = vpop.f32.mrb[31].mxu0 }
 0x13b   : > { %v798_v49 = vpack.c.bf16 %v684_v48, %v678_v45 }
 0x13c   : > { %v829_v52 = vmax.bf16 %v2825_v13, %v797_v47 }
 0x13d   : > { %v830_v50 = vmax.bf16 %v2825_v13, %v798_v49  ;;  %v688_v51 = vpop.f32.mrb[32].mxu0 }
 0x13e   : > { %v690_v53 = vpop.f32.mrb[33].mxu0 }
 0x13f   : > { %1153 = vmatprep.mubr.bf16.mxu1 %v830_v50 }
 0x140   : > { %1154 = vmatmul.mubr.bf16.gmra.mrb[28].mxu1 %v829_v52 }
 0x141   : > { %v694_v54 = vpop.f32.mrb[34].mxu0 }
 0x142   : > { %v799_v55 = vpack.c.bf16 %v694_v54, %v688_v51  ;;  %v696_v56 = vpop.f32.mrb[35].mxu0 }
 0x143   : > { %v800_v57 = vpack.c.bf16 %v696_v56, %v690_v53 }
 0x144   : > { %v831_v60 = vmax.bf16 %v2825_v13, %v799_v55  ;;  %v881_v55 = vlaneseq }
 0x145   : > { %v832_v58 = vmax.bf16 %v2825_v13, %v800_v57  ;;  %v700_v59 = vpop.f32.mrb[36].mxu0  ;;  %v2791_v57 = vld [vmem:[%s3768_s6 + $0x40] sm:$0xff]  }
 0x146   : > { %v702_v61 = vpop.f32.mrb[37].mxu0  ;;  %v3360_v56 = vshrl.u32 %v881_v55, 7  ;;  %2665 = vmatprep.subr.bf16.mxu1 %v2791_v57  ;;  %2521 = vmatprep.subr.bf16.mxu0 %v2791_v57  ;;  %vm2375_vm2 = vcmp.lt.s32.totalorder %v881_v55, 256 }
 0x147   : > { %1163 = vmatprep.mubr.bf16.mxu1 %v832_v58  ;;  %v2792_v58 = vld [vmem:[%s3768_s6] sm:$0xff]  }
 0x148   : > { %1164 = vmatmul.mubr.bf16.gmra.mrb[32].mxu1 %v831_v60  ;;  %v879_v60 = vld [vmem:[%s3765_s3] sm:$0x3] }
 0x149   : > { %v706_v62 = vpop.f32.mrb[38].mxu0  ;;  %2673 = vmatpush3.bf16.msra.mxu1 %v2792_v58 }
 0x14a   : > { %v801_v63 = vpack.c.bf16 %v706_v62, %v700_v59  ;;  %v708_v0 = vpop.f32.mrb[39].mxu0  ;;  %v3369_v59 = vsub.s32 0, %v3360_v56 }
 0x14b   : > { %v802_v1 = vpack.c.bf16 %v708_v0, %v702_v61  ;;  %v887_v61 = vsub.s32 1, %v3360_v56 }
 0x14c   : > { %v833_v4 = vmax.bf16 %v2825_v13, %v801_v63  ;;  %v3376_v62 = vrot.slane %v879_v60, %v3369_v59 }
 0x14d   : > { %v834_v2 = vmax.bf16 %v2825_v13, %v802_v1  ;;  %v712_v3 = vpop.f32.mrb[40].mxu0  ;;  %v3380_v0 = vrot.slane %v879_v60, %v887_v61 }
 0x14e   : > { %v714_v5 = vpop.f32.mrb[41].mxu0 }
 0x14f   : > { %1173 = vmatprep.mubr.bf16.mxu1 %v834_v2 }
 0x150   : > { %1174 = vmatmul.mubr.bf16.gmra.mrb[36].mxu1 %v833_v4 }
 0x151   : > { %v718_v6 = vpop.f32.mrb[42].mxu0 }
 0x152   : > { %v803_v7 = vpack.c.bf16 %v718_v6, %v712_v3  ;;  %v720_v9 = vpop.f32.mrb[43].mxu0  ;;  %v2793_v6 = vld [vmem:[%s3768_s6 + $0x48] sm:$0xff]  }
 0x153   : > { %v804_v10 = vpack.c.bf16 %v720_v9, %v714_v5  ;;  %2666 = vmatprep.subr.bf16.mxu1 %v2793_v6 }
 0x154   : > { %v835_v14 = vmax.bf16 %v2825_v13, %v803_v7 }
 0x155   : > { %v836_v11 = vmax.bf16 %v2825_v13, %v804_v10  ;;  %v724_v12 = vpop.f32.mrb[44].mxu0  ;;  %v2794_v10 = vld [vmem:[%s3768_s6 + $0x8] sm:$0xff]  }
 0x156   : > { %v726_v15 = vpop.f32.mrb[45].mxu0  ;;  %2674 = vmatpush3.bf16.msra.mxu1 %v2794_v10 }
 0x157   : > { %1183 = vmatprep.mubr.bf16.mxu1 %v836_v11 }
 0x158   : > { %1184 = vmatmul.mubr.bf16.gmra.mrb[40].mxu1 %v835_v14 }
 0x159   : > { %v730_v16 = vpop.f32.mrb[46].mxu0 }
 0x15a   : > { %v805_v17 = vpack.c.bf16 %v730_v16, %v724_v12  ;;  %v732_v18 = vpop.f32.mrb[47].mxu0  ;;  %v2795_v12 = vld [vmem:[%s3768_s6 + $0x50] sm:$0xff]  }
 0x15b   : > { %v806_v19 = vpack.c.bf16 %v732_v18, %v726_v15  ;;  %2667 = vmatprep.subr.bf16.mxu1 %v2795_v12 }
 0x15c   : > { %v837_v22 = vmax.bf16 %v2825_v13, %v805_v17  ;;  %v2796_v17 = vld [vmem:[%s3768_s6 + $0x10] sm:$0xff]  }
 0x15d   : > { %v838_v20 = vmax.bf16 %v2825_v13, %v806_v19  ;;  %v736_v21 = vpop.f32.mrb[48].mxu0  ;;  %2675 = vmatpush3.bf16.msra.mxu1 %v2796_v17 }
 0x15e   : > { %v738_v23 = vpop.f32.mrb[49].mxu0 }
 0x15f   : > { %1193 = vmatprep.mubr.bf16.mxu1 %v838_v20  ;;  %v2797_v20 = vld [vmem:[%s3768_s6 + $0x58] sm:$0xff]  }
 0x160   : > { %1194 = vmatmul.mubr.bf16.gmra.mrb[44].mxu1 %v837_v22  ;;  %2668 = vmatprep.subr.bf16.mxu1 %v2797_v20 }
 0x161   : > { %v742_v8 = vpop.f32.mrb[50].mxu0 }
 0x162   : > { %v807_v26 = vpack.c.bf16 %v742_v8, %v736_v21  ;;  %v744_v27 = vpop.f32.mrb[51].mxu0 }
 0x163   : > { %v808_v28 = vpack.c.bf16 %v744_v27, %v738_v23 }
 0x164   : > { %v839_v31 = vmax.bf16 %v2825_v13, %v807_v26  ;;  %v2798_v26 = vld [vmem:[%s3768_s6 + $0x18] sm:$0xff]  }
 0x165   : > { %v840_v29 = vmax.bf16 %v2825_v13, %v808_v28  ;;  %v748_v30 = vpop.f32.mrb[52].mxu0  ;;  %v2799_v28 = vld [vmem:[%s3768_s6 + $0x60] sm:$0xff]   ;;  %2676 = vmatpush3.bf16.msra.mxu1 %v2798_v26 }
 0x166   : > { %v750_v32 = vpop.f32.mrb[53].mxu0  ;;  %2669 = vmatprep.subr.bf16.mxu1 %v2799_v28 }
 0x167   : > { %1203 = vmatprep.mubr.bf16.mxu1 %v840_v29 }
 0x168   : > { %1204 = vmatmul.mubr.bf16.gmra.mrb[48].mxu1 %v839_v31 }
 0x169   : > { %v754_v33 = vpop.f32.mrb[54].mxu0 }
 0x16a   : > { %v809_v34 = vpack.c.bf16 %v754_v33, %v748_v30  ;;  %v756_v35 = vpop.f32.mrb[55].mxu0 }
 0x16b   : > { %v810_v36 = vpack.c.bf16 %v756_v35, %v750_v32  ;;  %v2800_v32 = vld [vmem:[%s3768_s6 + $0x20] sm:$0xff]   ;;  %v2801_v35 = vld [vmem:[%s3768_s6 + $0x68] sm:$0xff]  }
 0x16c   : > { %v841_v39 = vmax.bf16 %v2825_v13, %v809_v34  ;;  %2677 = vmatpush3.bf16.msra.mxu1 %v2800_v32 }
 0x16d   : > { %v842_v37 = vmax.bf16 %v2825_v13, %v810_v36  ;;  %v760_v38 = vpop.f32.mrb[56].mxu0  ;;  %2670 = vmatprep.subr.bf16.mxu1 %v2801_v35 }
 0x16e   : > { %v762_v40 = vpop.f32.mrb[57].mxu0 }
 0x16f   : > { %1213 = vmatprep.mubr.bf16.mxu1 %v842_v37 }
 0x170   : > { %1214 = vmatmul.mubr.bf16.gmra.mrb[52].mxu1 %v841_v39 }
 0x171   : > { %v766_v41 = vpop.f32.mrb[58].mxu0 }
 0x172   : > { %v811_v42 = vpack.c.bf16 %v766_v41, %v760_v38  ;;  %v768_v43 = vpop.f32.mrb[59].mxu0 }
 0x173   : > { %v812_v44 = vpack.c.bf16 %v768_v43, %v762_v40 }
 0x174   : > { %v843_v47 = vmax.bf16 %v2825_v13, %v811_v42  ;;  %v2802_v42 = vld [vmem:[%s3768_s6 + $0x28] sm:$0xff]  }
 0x175   : > { %v844_v45 = vmax.bf16 %v2825_v13, %v812_v44  ;;  %v772_v46 = vpop.f32.mrb[60].mxu0  ;;  %v2803_v44 = vld [vmem:[%s3768_s6 + $0x70] sm:$0xff]   ;;  %2678 = vmatpush3.bf16.msra.mxu1 %v2802_v42 }
 0x176   : > { %v774_v48 = vpop.f32.mrb[61].mxu0  ;;  %2671 = vmatprep.subr.bf16.mxu1 %v2803_v44 }
 0x177   : > { %1223 = vmatprep.mubr.bf16.mxu1 %v844_v45 }
 0x178   : > { %1224 = vmatmul.mubr.bf16.gmra.mrb[56].mxu1 %v843_v47 }
 0x179   : > { %v778_v49 = vpop.f32.mrb[62].mxu0 }
 0x17a   : > { %v813_v50 = vpack.c.bf16 %v778_v49, %v772_v46  ;;  %v780_v51 = vpop.f32.mrb[63].mxu0 }
 0x17b   : > { %v814_v52 = vpack.c.bf16 %v780_v51, %v774_v48  ;;  %v2804_v48 = vld [vmem:[%s3768_s6 + $0x30] sm:$0xff]  }
 0x17c   : > { %v845_v54 = vmax.bf16 %v2825_v13, %v813_v50  ;;  %2679 = vmatpush3.bf16.msra.mxu1 %v2804_v48 }
 0x17d   : > { %v846_v53 = vmax.bf16 %v2825_v13, %v814_v52 }
 0x17f   : > { %1233 = vmatprep.mubr.bf16.mxu1 %v846_v53 }
 0x180   : > { %1234 = vmatmul.mubr.bf16.gmra.mrb[60].mxu1 %v845_v54 }
 0x1db   : > { %v1085_v63 = vpop.f32.mrb[0].mxu1 }
 0x1dc   : > { %v1087_v1 = vpop.f32.mrb[1].mxu1  ;;  %v1086_v3 = vadd.f32 %v1085_v63, %v3376_v62 }
 0x1dd   : > { %v1089_v2 = vpop.f32.mrb[2].mxu1  ;;  %v1088_v7 = vadd.f32 %v1087_v1, %v3380_v0 }
 0x1de   : > { %v1090_v4 = vadd.f32 %v1089_v2, %v3376_v62  ;;  %v1091_v5 = vpop.f32.mrb[3].mxu1 }
 0x1df   : > { %v1092_v9 = vadd.f32 %v1091_v5, %v3380_v0 }
 0x1e0   : > { %v1244_v11 = vpack.c.bf16 %v1090_v4, %v1086_v3 }
 0x1e1   : > { %v1245_v14 = vpack.c.bf16 %v1092_v9, %v1088_v7 }
 0x1e2   : > { %v1276_v18 = vmax.bf16 %v2825_v13, %v1244_v11 }
 0x1e3   : > { %v1095_v15 = vpop.f32.mrb[4].mxu1  ;;  %v1277_v16 = vmax.bf16 %v2825_v13, %v1245_v14 }
 0x1e4   : > { %v1097_v19 = vpop.f32.mrb[5].mxu1  ;;  %v1096_v22 = vadd.f32 %v1095_v15, %v3376_v62 }
 0x1e5   : > { %v1099_v21 = vpop.f32.mrb[6].mxu1  ;;  %1544 = vmatprep.mubr.bf16.mxu0 %v1277_v16  ;;  %v1098_v8 = vadd.f32 %v1097_v19, %v3380_v0 }
 0x1e6   : > { %v1100_v23 = vadd.f32 %v1099_v21, %v3376_v62  ;;  %v1101_v24 = vpop.f32.mrb[7].mxu1  ;;  %1545 = vmatmul.mubr.bf16.vlgmr.msra.gmra.mrb[64].mxu0 %v1276_v18 }
 0x1e7   : > { %v1102_v25 = vadd.f32 %v1101_v24, %v3380_v0  ;;  %2522 = vmatpush3.bf16.msra.mxu0 %v2792_v58 }
 0x1e8   : > { %v1246_v27 = vpack.c.bf16 %v1100_v23, %v1096_v22  ;;  %2523 = vmatprep.subr.bf16.mxu0 %v2793_v6 }
 0x1e9   : > { %v1247_v29 = vpack.c.bf16 %v1102_v25, %v1098_v8 }
 0x1ea   : > { %v1278_v34 = vmax.bf16 %v2825_v13, %v1246_v27 }
 0x1eb   : > { %v1105_v30 = vpop.f32.mrb[8].mxu1  ;;  %v1279_v31 = vmax.bf16 %v2825_v13, %v1247_v29  ;;  %2524 = vmatpush3.bf16.msra.mxu0 %v2794_v10 }
 0x1ec   : > { %v1107_v33 = vpop.f32.mrb[9].mxu1  ;;  %2525 = vmatprep.subr.bf16.mxu0 %v2795_v12  ;;  %v1106_v37 = vadd.f32 %v1105_v30, %v3376_v62 }
 0x1ed   : > { %v1109_v36 = vpop.f32.mrb[10].mxu1  ;;  %1554 = vmatprep.mubr.bf16.mxu0 %v1279_v31  ;;  %v1108_v40 = vadd.f32 %v1107_v33, %v3380_v0 }
 0x1ee   : > { %v1110_v38 = vadd.f32 %v1109_v36, %v3376_v62  ;;  %v1111_v39 = vpop.f32.mrb[11].mxu1  ;;  %1555 = vmatmul.mubr.bf16.gmra.mrb[68].mxu0 %v1278_v34 }
 0x1ef   : > { %v1112_v41 = vadd.f32 %v1111_v39, %v3380_v0  ;;  %2526 = vmatpush3.bf16.msra.mxu0 %v2796_v17 }
 0x1f0   : > { %v1248_v43 = vpack.c.bf16 %v1110_v38, %v1106_v37  ;;  %2527 = vmatprep.subr.bf16.mxu0 %v2797_v20 }
 0x1f1   : > { %v1249_v45 = vpack.c.bf16 %v1112_v41, %v1108_v40 }
 0x1f2   : > { %v1280_v50 = vmax.bf16 %v2825_v13, %v1248_v43 }
 0x1f3   : > { %v1115_v46 = vpop.f32.mrb[12].mxu1  ;;  %v1281_v47 = vmax.bf16 %v2825_v13, %v1249_v45  ;;  %2528 = vmatpush3.bf16.msra.mxu0 %v2798_v26 }
 0x1f4   : > { %v1117_v49 = vpop.f32.mrb[13].mxu1  ;;  %2529 = vmatprep.subr.bf16.mxu0 %v2799_v28  ;;  %v1116_v52 = vadd.f32 %v1115_v46, %v3376_v62 }
 0x1f5   : > { %v1119_v51 = vpop.f32.mrb[14].mxu1  ;;  %1564 = vmatprep.mubr.bf16.mxu0 %v1281_v47  ;;  %v1118_v57 = vadd.f32 %v1117_v49, %v3380_v0 }
 0x1f6   : > { %v1120_v53 = vadd.f32 %v1119_v51, %v3376_v62  ;;  %v1121_v54 = vpop.f32.mrb[15].mxu1  ;;  %1565 = vmatmul.mubr.bf16.gmra.mrb[72].mxu0 %v1280_v50 }
 0x1f7   : > { %v1122_v58 = vadd.f32 %v1121_v54, %v3380_v0  ;;  %2530 = vmatpush3.bf16.msra.mxu0 %v2800_v32 }
 0x1f8   : > { %v1250_v60 = vpack.c.bf16 %v1120_v53, %v1116_v52  ;;  %2531 = vmatprep.subr.bf16.mxu0 %v2801_v35 }
 0x1f9   : > { %v1251_v63 = vpack.c.bf16 %v1122_v58, %v1118_v57 }
 0x1fa   : > { %v1282_v4 = vmax.bf16 %v2825_v13, %v1250_v60 }
 0x1fb   : > { %v1125_v1 = vpop.f32.mrb[16].mxu1  ;;  %v1283_v2 = vmax.bf16 %v2825_v13, %v1251_v63  ;;  %2532 = vmatpush3.bf16.msra.mxu0 %v2802_v42 }
 0x1fc   : > { %v1127_v3 = vpop.f32.mrb[17].mxu1  ;;  %2533 = vmatprep.subr.bf16.mxu0 %v2803_v44  ;;  %v1126_v6 = vadd.f32 %v1125_v1, %v3376_v62 }
 0x1fd   : > { %v1129_v5 = vpop.f32.mrb[18].mxu1  ;;  %1574 = vmatprep.mubr.bf16.mxu0 %v1283_v2  ;;  %v1128_v10 = vadd.f32 %v1127_v3, %v3380_v0 }
 0x1fe   : > { %v1130_v7 = vadd.f32 %v1129_v5, %v3376_v62  ;;  %v1131_v9 = vpop.f32.mrb[19].mxu1  ;;  %1575 = vmatmul.mubr.bf16.gmra.mrb[76].mxu0 %v1282_v4 }
 0x1ff   : > { %v1132_v11 = vadd.f32 %v1131_v9, %v3380_v0  ;;  %2534 = vmatpush3.bf16.msra.mxu0 %v2804_v48 }
 0x200   : > { %v1252_v12 = vpack.c.bf16 %v1130_v7, %v1126_v6 }
 0x201   : > { %v1253_v14 = vpack.c.bf16 %v1132_v11, %v1128_v10 }
 0x202   : > { %v1284_v18 = vmax.bf16 %v2825_v13, %v1252_v12 }
 0x203   : > { %v1135_v15 = vpop.f32.mrb[20].mxu1  ;;  %v1285_v16 = vmax.bf16 %v2825_v13, %v1253_v14 }
 0x204   : > { %v1137_v17 = vpop.f32.mrb[21].mxu1  ;;  %v1136_v20 = vadd.f32 %v1135_v15, %v3376_v62 }
 0x205   : > { %v1139_v19 = vpop.f32.mrb[22].mxu1  ;;  %1584 = vmatprep.mubr.bf16.mxu0 %v1285_v16  ;;  %v1138_v23 = vadd.f32 %v1137_v17, %v3380_v0 }
 0x206   : > { %v1140_v21 = vadd.f32 %v1139_v19, %v3376_v62  ;;  %v1141_v22 = vpop.f32.mrb[23].mxu1  ;;  %1585 = vmatmul.mubr.bf16.gmra.mrb[80].mxu0 %v1284_v18 }
 0x207   : > { %v1142_v24 = vadd.f32 %v1141_v22, %v3380_v0 }
 0x208   : > { %v1254_v8 = vpack.c.bf16 %v1140_v21, %v1136_v20 }
 0x209   : > { %v1255_v25 = vpack.c.bf16 %v1142_v24, %v1138_v23 }
 0x20a   : > { %v1286_v29 = vmax.bf16 %v2825_v13, %v1254_v8 }
 0x20b   : > { %v1145_v26 = vpop.f32.mrb[24].mxu1  ;;  %v1287_v27 = vmax.bf16 %v2825_v13, %v1255_v25 }
 0x20c   : > { %v1147_v28 = vpop.f32.mrb[25].mxu1  ;;  %v1146_v31 = vadd.f32 %v1145_v26, %v3376_v62 }
 0x20d   : > { %v1149_v30 = vpop.f32.mrb[26].mxu1  ;;  %1594 = vmatprep.mubr.bf16.mxu0 %v1287_v27  ;;  %v1148_v34 = vadd.f32 %v1147_v28, %v3380_v0 }
 0x20e   : > { %v1150_v32 = vadd.f32 %v1149_v30, %v3376_v62  ;;  %v1151_v33 = vpop.f32.mrb[27].mxu1  ;;  %1595 = vmatmul.mubr.bf16.gmra.mrb[84].mxu0 %v1286_v29 }
 0x20f   : > { %v1152_v35 = vadd.f32 %v1151_v33, %v3380_v0 }
 0x210   : > { %v1256_v36 = vpack.c.bf16 %v1150_v32, %v1146_v31 }
 0x211   : > { %v1257_v37 = vpack.c.bf16 %v1152_v35, %v1148_v34 }
 0x212   : > { %v1288_v41 = vmax.bf16 %v2825_v13, %v1256_v36 }
 0x213   : > { %v1155_v38 = vpop.f32.mrb[28].mxu1  ;;  %v1289_v39 = vmax.bf16 %v2825_v13, %v1257_v37 }
 0x214   : > { %v1157_v40 = vpop.f32.mrb[29].mxu1  ;;  %v1156_v43 = vadd.f32 %v1155_v38, %v3376_v62 }
 0x215   : > { %v1159_v42 = vpop.f32.mrb[30].mxu1  ;;  %1604 = vmatprep.mubr.bf16.mxu0 %v1289_v39  ;;  %v1158_v46 = vadd.f32 %v1157_v40, %v3380_v0 }
 0x216   : > { %v1160_v44 = vadd.f32 %v1159_v42, %v3376_v62  ;;  %v1161_v45 = vpop.f32.mrb[31].mxu1  ;;  %1605 = vmatmul.mubr.bf16.gmra.mrb[88].mxu0 %v1288_v41 }
 0x217   : > { %v1162_v47 = vadd.f32 %v1161_v45, %v3380_v0 }
 0x218   : > { %v1258_v48 = vpack.c.bf16 %v1160_v44, %v1156_v43 }
 0x219   : > { %v1259_v49 = vpack.c.bf16 %v1162_v47, %v1158_v46 }
 0x21a   : > { %v1290_v53 = vmax.bf16 %v2825_v13, %v1258_v48 }
 0x21b   : > { %v1165_v50 = vpop.f32.mrb[32].mxu1  ;;  %v1291_v51 = vmax.bf16 %v2825_v13, %v1259_v49  ;;  %v2805_v49 = vld [vmem:[%s3768_s6 + $0x78] sm:$0xff]  }
 0x21c   : > { %v1167_v52 = vpop.f32.mrb[33].mxu1  ;;  %v1166_v57 = vadd.f32 %v1165_v50, %v3376_v62  ;;  %2535 = vmatprep.subr.bf16.mxu0 %v2805_v49  ;;  %2672 = vmatprep.subr.bf16.mxu1 %v2805_v49 }
 0x21d   : > { %v1169_v54 = vpop.f32.mrb[34].mxu1  ;;  %1614 = vmatprep.mubr.bf16.mxu0 %v1291_v51  ;;  %v1168_v63 = vadd.f32 %v1167_v52, %v3380_v0  ;;  %v2806_v52 = vld [vmem:[%s3768_s6 + $0x38] sm:$0xff]  }
 0x21e   : > { %v1170_v58 = vadd.f32 %v1169_v54, %v3376_v62  ;;  %v1171_v60 = vpop.f32.mrb[35].mxu1  ;;  %1615 = vmatmul.mubr.bf16.gmra.mrb[92].mxu0 %v1290_v53  ;;  %2680 = vmatpush3.bf16.msra.mxu1 %v2806_v52 }
 0x21f   : > { %v1172_v1 = vadd.f32 %v1171_v60, %v3380_v0  ;;  %2536 = vmatpush3.bf16.msra.mxu0 %v2806_v52  ;;  %v2165_v52 = vld [vmem:[%s3770_s8 + $0x20] sm:$0xff] }
 0x220   : > { %v1260_v2 = vpack.c.bf16 %v1170_v58, %v1166_v57 }
 0x221   : > { %v1261_v3 = vpack.c.bf16 %v1172_v1, %v1168_v63 }
 0x222   : > { %v1292_v7 = vmax.bf16 %v2825_v13, %v1260_v2 }
 0x223   : > { %v1175_v4 = vpop.f32.mrb[36].mxu1  ;;  %v1293_v5 = vmax.bf16 %v2825_v13, %v1261_v3 }
 0x224   : > { %v1177_v6 = vpop.f32.mrb[37].mxu1  ;;  %v1176_v10 = vadd.f32 %v1175_v4, %v3376_v62 }
 0x225   : > { %v1179_v9 = vpop.f32.mrb[38].mxu1  ;;  %1624 = vmatprep.mubr.bf16.mxu0 %v1293_v5  ;;  %v1178_v14 = vadd.f32 %v1177_v6, %v3380_v0 }
 0x226   : > { %v1180_v11 = vadd.f32 %v1179_v9, %v3376_v62  ;;  %v1181_v12 = vpop.f32.mrb[39].mxu1  ;;  %1625 = vmatmul.mubr.bf16.gmra.mrb[96].mxu0 %v1292_v7 }
 0x227   : > { %v1182_v15 = vadd.f32 %v1181_v12, %v3380_v0 }
 0x228   : > { %v1262_v16 = vpack.c.bf16 %v1180_v11, %v1176_v10 }
 0x229   : > { %v1263_v17 = vpack.c.bf16 %v1182_v15, %v1178_v14 }
 0x22a   : > { %v1294_v21 = vmax.bf16 %v2825_v13, %v1262_v16 }
 0x22b   : > { %v1185_v18 = vpop.f32.mrb[40].mxu1  ;;  %v1295_v19 = vmax.bf16 %v2825_v13, %v1263_v17 }
 0x22c   : > { %v1187_v20 = vpop.f32.mrb[41].mxu1  ;;  %v1186_v23 = vadd.f32 %v1185_v18, %v3376_v62 }
 0x22d   : > { %v1189_v22 = vpop.f32.mrb[42].mxu1  ;;  %1634 = vmatprep.mubr.bf16.mxu0 %v1295_v19  ;;  %v1188_v25 = vadd.f32 %v1187_v20, %v3380_v0 }
 0x22e   : > { %v1190_v24 = vadd.f32 %v1189_v22, %v3376_v62  ;;  %v1191_v8 = vpop.f32.mrb[43].mxu1  ;;  %1635 = vmatmul.mubr.bf16.gmra.mrb[100].mxu0 %v1294_v21 }
 0x22f   : > { %v1192_v26 = vadd.f32 %v1191_v8, %v3380_v0 }
 0x230   : > { %v1264_v27 = vpack.c.bf16 %v1190_v24, %v1186_v23 }
 0x231   : > { %v1265_v28 = vpack.c.bf16 %v1192_v26, %v1188_v25 }
 0x232   : > { %v1296_v32 = vmax.bf16 %v2825_v13, %v1264_v27 }
 0x233   : > { %v1195_v29 = vpop.f32.mrb[44].mxu1  ;;  %v1297_v30 = vmax.bf16 %v2825_v13, %v1265_v28 }
 0x234   : > { %v1197_v31 = vpop.f32.mrb[45].mxu1  ;;  %v1196_v34 = vadd.f32 %v1195_v29, %v3376_v62 }
 0x235   : > { %v1199_v33 = vpop.f32.mrb[46].mxu1  ;;  %1644 = vmatprep.mubr.bf16.mxu0 %v1297_v30  ;;  %v1198_v37 = vadd.f32 %v1197_v31, %v3380_v0 }
 0x236   : > { %v1200_v35 = vadd.f32 %v1199_v33, %v3376_v62  ;;  %v1201_v36 = vpop.f32.mrb[47].mxu1  ;;  %1645 = vmatmul.mubr.bf16.gmra.mrb[104].mxu0 %v1296_v32 }
 0x237   : > { %v1202_v38 = vadd.f32 %v1201_v36, %v3380_v0  ;;  %v1340_v36 = vld [vmem:[%s3767_s5] sm:$0x3] }
 0x238   : > { %v1266_v39 = vpack.c.bf16 %v1200_v35, %v1196_v34 }
 0x239   : > { %v1267_v40 = vpack.c.bf16 %v1202_v38, %v1198_v37  ;;  %v3528_v38 = vrot.slane %v1340_v36, %v887_v61  ;;  %v2162_v61 = vld [vmem:[%s3770_s8 + $0x8] sm:$0xff] }
 0x23a   : > { %v1298_v44 = vmax.bf16 %v2825_v13, %v1266_v39 }
 0x23b   : > { %v1205_v41 = vpop.f32.mrb[48].mxu1  ;;  %v1299_v42 = vmax.bf16 %v2825_v13, %v1267_v40 }
 0x23c   : > { %v1207_v43 = vpop.f32.mrb[49].mxu1  ;;  %v1206_v46 = vadd.f32 %v1205_v41, %v3376_v62 }
 0x23d   : > { %v1209_v45 = vpop.f32.mrb[50].mxu1  ;;  %1654 = vmatprep.mubr.bf16.mxu0 %v1299_v42  ;;  %v1208_v50 = vadd.f32 %v1207_v43, %v3380_v0  ;;  %v2161_v43 = vld [vmem:[%s3770_s8] sm:$0xff] }
 0x23e   : > { %v1210_v47 = vadd.f32 %v1209_v45, %v3376_v62  ;;  %v1211_v48 = vpop.f32.mrb[51].mxu1  ;;  %1655 = vmatmul.mubr.bf16.gmra.mrb[108].mxu0 %v1298_v44  ;;  %2179 = vperm.xlu0 %2693, %v2161_v43  }
 0x23f   : > { %v1212_v51 = vadd.f32 %v1211_v48, %v3380_v0 }
 0x240   : > { %v1268_v53 = vpack.c.bf16 %v1210_v47, %v1206_v46 }
 0x241   : > { %v1269_v54 = vpack.c.bf16 %v1212_v51, %v1208_v50 }
 0x242   : > { %v1300_v63 = vmax.bf16 %v2825_v13, %v1268_v53  ;;  %2184 = vperm.xlu0 %2693, %v2162_v61  }
 0x243   : > { %v1215_v57 = vpop.f32.mrb[52].mxu1  ;;  %v1301_v58 = vmax.bf16 %v2825_v13, %v1269_v54 }
 0x244   : > { %v1217_v60 = vpop.f32.mrb[53].mxu1  ;;  %v1216_v2 = vadd.f32 %v1215_v57, %v3376_v62 }
 0x245   : > { %v1219_v1 = vpop.f32.mrb[54].mxu1  ;;  %1664 = vmatprep.mubr.bf16.mxu0 %v1301_v58  ;;  %v1218_v5 = vadd.f32 %v1217_v60, %v3380_v0 }
 0x246   : > { %v1220_v3 = vadd.f32 %v1219_v1, %v3376_v62  ;;  %v1221_v4 = vpop.f32.mrb[55].mxu1  ;;  %1665 = vmatmul.mubr.bf16.gmra.mrb[112].mxu0 %v1300_v63  ;;  %2199 = vperm.xlu0 %2693, %v2165_v52  }
 0x247   : > { %v1222_v6 = vadd.f32 %v1221_v4, %v3380_v0 }
 0x248   : > { %v1270_v7 = vpack.c.bf16 %v1220_v3, %v1216_v2  ;;  %v2167_v2 = vld [vmem:[%s3770_s8 + $0x30] sm:$0xff] }
 0x249   : > { %v1271_v9 = vpack.c.bf16 %v1222_v6, %v1218_v5 }
 0x24a   : > { %v1302_v14 = vmax.bf16 %v2825_v13, %v1270_v7  ;;  %2209 = vperm.xlu0 %2693, %v2167_v2  }
 0x24b   : > { %v1225_v10 = vpop.f32.mrb[56].mxu1  ;;  %v1303_v11 = vmax.bf16 %v2825_v13, %v1271_v9  ;;  %v2169_v9 = vld [vmem:[%s3770_s8 + $0x40] sm:$0xff] }
 0x24c   : > { %v1227_v12 = vpop.f32.mrb[57].mxu1  ;;  %v1226_v16 = vadd.f32 %v1225_v10, %v3376_v62 }
 0x24d   : > { %v1229_v15 = vpop.f32.mrb[58].mxu1  ;;  %1674 = vmatprep.mubr.bf16.mxu0 %v1303_v11  ;;  %v1228_v19 = vadd.f32 %v1227_v12, %v3380_v0 }
 0x24e   : > { %v1230_v17 = vadd.f32 %v1229_v15, %v3376_v62  ;;  %v1231_v18 = vpop.f32.mrb[59].mxu1  ;;  %1675 = vmatmul.mubr.bf16.gmra.mrb[116].mxu0 %v1302_v14  ;;  %2219 = vperm.xlu0 %2693, %v2169_v9  }
 0x24f   : > { %v1232_v20 = vadd.f32 %v1231_v18, %v3380_v0  ;;  %v2171_v18 = vld [vmem:[%s3770_s8 + $0x50] sm:$0xff] }
 0x250   : > { %v1272_v21 = vpack.c.bf16 %v1230_v17, %v1226_v16 }
 0x251   : > { %v1273_v22 = vpack.c.bf16 %v1232_v20, %v1228_v19 }
 0x252   : > { %v1304_v25 = vmax.bf16 %v2825_v13, %v1272_v21  ;;  %2229 = vperm.xlu0 %2693, %v2171_v18  }
 0x253   : > { %v1235_v23 = vpop.f32.mrb[60].mxu1  ;;  %v1305_v24 = vmax.bf16 %v2825_v13, %v1273_v22 }
 0x254   : > { %v1237_v8 = vpop.f32.mrb[61].mxu1  ;;  %v1236_v27 = vadd.f32 %v1235_v23, %v3376_v62 }
 0x255   : > { %v1239_v26 = vpop.f32.mrb[62].mxu1  ;;  %1684 = vmatprep.mubr.bf16.mxu0 %v1305_v24  ;;  %v1238_v30 = vadd.f32 %v1237_v8, %v3380_v0  ;;  %v2173_v24 = vld [vmem:[%s3770_s8 + $0x60] sm:$0xff] }
 0x256   : > { %v1240_v28 = vadd.f32 %v1239_v26, %v3376_v62  ;;  %v1241_v29 = vpop.f32.mrb[63].mxu1  ;;  %1685 = vmatmul.mubr.bf16.gmra.mrb[120].mxu0 %v1304_v25  ;;  %v3524_v62 = vrot.slane %v1340_v36, %v3369_v59  ;;  %2239 = vperm.xlu0 %2693, %v2173_v24  }
 0x257   : > { %v1242_v31 = vadd.f32 %v1241_v29, %v3380_v0 }
 0x258   : > { %v1274_v32 = vpack.c.bf16 %v1240_v28, %v1236_v27 }
 0x259   : > { %v1275_v33 = vpack.c.bf16 %v1242_v31, %v1238_v30 }
 0x25a   : > { %v1306_v35 = vmax.bf16 %v2825_v13, %v1274_v32 }
 0x25b   : > { %v1307_v34 = vmax.bf16 %v2825_v13, %v1275_v33 }
 0x25d   : > { %1694 = vmatprep.mubr.bf16.mxu0 %v1307_v34 }
 0x25e   : > { %1695 = vmatmul.mubr.bf16.gmra.mrb[124].mxu0 %v1306_v35 }
 0x2b9   : > { %v1546_v37 = vpop.f32.mrb[64].mxu0 }
 0x2ba   : > { %v1548_v0 = vpop.f32.mrb[65].mxu0  ;;  %v1547_v40 = vadd.f32 %v1546_v37, %v3524_v62 }
 0x2bb   : > { %v1550_v39 = vpop.f32.mrb[66].mxu0  ;;  %v1549_v44 = vadd.f32 %v1548_v0, %v3528_v38 }
 0x2bc   : > { %v1551_v41 = vadd.f32 %v1550_v39, %v3524_v62  ;;  %v1552_v42 = vpop.f32.mrb[67].mxu0 }
 0x2bd   : > { %v1553_v45 = vadd.f32 %v1552_v42, %v3528_v38 }
 0x2be   : > { %v1705_v46 = vpack.c.bf16 %v1551_v41, %v1547_v40 }
 0x2bf   : > { %v1706_v47 = vpack.c.bf16 %v1553_v45, %v1549_v44 }
 0x2c0   : > { %v1737_v50 = vmax.bf16 %v2825_v13, %v1705_v46 }
 0x2c1   : > { %v1556_v48 = vpop.f32.mrb[68].mxu0  ;;  %v1738_v49 = vmax.bf16 %v2825_v13, %v1706_v47 }
 0x2c2   : > { %v1558_v51 = vpop.f32.mrb[69].mxu0  ;;  %v1557_v54 = vadd.f32 %v1556_v48, %v3524_v62 }
 0x2c3   : > { %v1560_v53 = vpop.f32.mrb[70].mxu0  ;;  %1936 = vmatprep.mubr.bf16.mxu0 %v1738_v49  ;;  %v1559_v60 = vadd.f32 %v1558_v51, %v3528_v38 }
 0x2c4   : > { %v1561_v57 = vadd.f32 %v1560_v53, %v3524_v62  ;;  %v1562_v58 = vpop.f32.mrb[71].mxu0  ;;  %1937 = vmatmul.mubr.bf16.vlgmr.msra.gmra.mrb[128].mxu0 %v1737_v50 }
 0x2c5   : > { %v1563_v63 = vadd.f32 %v1562_v58, %v3528_v38 }
 0x2c6   : > { %v1707_v1 = vpack.c.bf16 %v1561_v57, %v1557_v54 }
 0x2c7   : > { %v1708_v3 = vpack.c.bf16 %v1563_v63, %v1559_v60 }
 0x2c8   : > { %v1739_v7 = vmax.bf16 %v2825_v13, %v1707_v1 }
 0x2c9   : > { %v1566_v4 = vpop.f32.mrb[72].mxu0  ;;  %v1740_v5 = vmax.bf16 %v2825_v13, %v1708_v3 }
 0x2ca   : > { %v1568_v6 = vpop.f32.mrb[73].mxu0  ;;  %v1567_v11 = vadd.f32 %v1566_v4, %v3524_v62 }
 0x2cb   : > { %v1570_v10 = vpop.f32.mrb[74].mxu0  ;;  %1944 = vmatprep.mubr.bf16.mxu0 %v1740_v5  ;;  %v1569_v15 = vadd.f32 %v1568_v6, %v3528_v38 }
 0x2cc   : > { %v1571_v12 = vadd.f32 %v1570_v10, %v3524_v62  ;;  %v1572_v14 = vpop.f32.mrb[75].mxu0  ;;  %1945 = vmatmul.mubr.bf16.gmra.mrb[132].mxu0 %v1739_v7 }
 0x2cd   : > { %v1573_v16 = vadd.f32 %v1572_v14, %v3528_v38 }
 0x2ce   : > { %v1709_v17 = vpack.c.bf16 %v1571_v12, %v1567_v11 }
 0x2cf   : > { %v1710_v19 = vpack.c.bf16 %v1573_v16, %v1569_v15 }
 0x2d0   : > { %v1741_v22 = vmax.bf16 %v2825_v13, %v1709_v17 }
 0x2d1   : > { %v1576_v20 = vpop.f32.mrb[76].mxu0  ;;  %v1742_v21 = vmax.bf16 %v2825_v13, %v1710_v19 }
 0x2d2   : > { %v1578_v23 = vpop.f32.mrb[77].mxu0  ;;  %v1577_v25 = vadd.f32 %v1576_v20, %v3524_v62 }
 0x2d3   : > { %v1580_v8 = vpop.f32.mrb[78].mxu0  ;;  %1952 = vmatprep.mubr.bf16.mxu1 %v1742_v21  ;;  %v1579_v28 = vadd.f32 %v1578_v23, %v3528_v38 }
 0x2d4   : > { %v1581_v26 = vadd.f32 %v1580_v8, %v3524_v62  ;;  %v1582_v27 = vpop.f32.mrb[79].mxu0  ;;  %1953 = vmatmul.mubr.bf16.vlgmr.msra.gmra.mrb[64].mxu1 %v1741_v22 }
 0x2d5   : > { %v1583_v29 = vadd.f32 %v1582_v27, %v3528_v38 }
 0x2d6   : > { %v1711_v30 = vpack.c.bf16 %v1581_v26, %v1577_v25 }
 0x2d7   : > { %v1712_v31 = vpack.c.bf16 %v1583_v29, %v1579_v28 }
 0x2d8   : > { %v1743_v35 = vmax.bf16 %v2825_v13, %v1711_v30 }
 0x2d9   : > { %v1586_v32 = vpop.f32.mrb[80].mxu0  ;;  %v1744_v33 = vmax.bf16 %v2825_v13, %v1712_v31 }
 0x2da   : > { %v1588_v34 = vpop.f32.mrb[81].mxu0  ;;  %v1587_v37 = vadd.f32 %v1586_v32, %v3524_v62 }
 0x2db   : > { %v1590_v36 = vpop.f32.mrb[82].mxu0  ;;  %1960 = vmatprep.mubr.bf16.mxu1 %v1744_v33  ;;  %v1589_v40 = vadd.f32 %v1588_v34, %v3528_v38 }
 0x2dc   : > { %v1591_v0 = vadd.f32 %v1590_v36, %v3524_v62  ;;  %v1592_v39 = vpop.f32.mrb[83].mxu0  ;;  %1961 = vmatmul.mubr.bf16.gmra.mrb[68].mxu1 %v1743_v35 }
 0x2dd   : > { %v1593_v41 = vadd.f32 %v1592_v39, %v3528_v38 }
 0x2de   : > { %v1713_v42 = vpack.c.bf16 %v1591_v0, %v1587_v37 }
 0x2df   : > { %v1714_v43 = vpack.c.bf16 %v1593_v41, %v1589_v40 }
 0x2e0   : > { %v1745_v61 = vmax.bf16 %v2825_v13, %v1713_v42 }
 0x2e1   : > { %v1596_v44 = vpop.f32.mrb[84].mxu0  ;;  %v1746_v45 = vmax.bf16 %v2825_v13, %v1714_v43 }
 0x2e2   : > { %v1598_v46 = vpop.f32.mrb[85].mxu0  ;;  %v1597_v48 = vadd.f32 %v1596_v44, %v3524_v62 }
 0x2e3   : > { %v1600_v47 = vpop.f32.mrb[86].mxu0  ;;  %1968 = vmatprep.mubr.bf16.mxu1 %v1746_v45  ;;  %v1599_v51 = vadd.f32 %v1598_v46, %v3528_v38 }
 0x2e4   : > { %v1601_v49 = vadd.f32 %v1600_v47, %v3524_v62  ;;  %v1602_v50 = vpop.f32.mrb[87].mxu0  ;;  %1969 = vmatmul.mubr.bf16.gmra.mrb[72].mxu1 %v1745_v61 }
 0x2e5   : > { %v1603_v52 = vadd.f32 %v1602_v50, %v3528_v38 }
 0x2e6   : > { %v1715_v53 = vpack.c.bf16 %v1601_v49, %v1597_v48 }
 0x2e7   : > { %v1716_v54 = vpack.c.bf16 %v1603_v52, %v1599_v51 }
 0x2e8   : > { %v1747_v63 = vmax.bf16 %v2825_v13, %v1715_v53 }
 0x2e9   : > { %v1606_v57 = vpop.f32.mrb[88].mxu0  ;;  %v1748_v58 = vmax.bf16 %v2825_v13, %v1716_v54 }
 0x2ea   : > { %v1608_v60 = vpop.f32.mrb[89].mxu0  ;;  %v1607_v2 = vadd.f32 %v1606_v57, %v3524_v62 }
 0x2eb   : > { %v1610_v1 = vpop.f32.mrb[90].mxu0  ;;  %1976 = vmatprep.mubr.bf16.mxu1 %v1748_v58  ;;  %v1609_v5 = vadd.f32 %v1608_v60, %v3528_v38 }
 0x2ec   : > { %v1611_v3 = vadd.f32 %v1610_v1, %v3524_v62  ;;  %v1612_v4 = vpop.f32.mrb[91].mxu0  ;;  %1977 = vmatmul.mubr.bf16.gmra.mrb[76].mxu1 %v1747_v63 }
 0x2ed   : > { %v1613_v6 = vadd.f32 %v1612_v4, %v3528_v38 }
 0x2ee   : > { %v1717_v7 = vpack.c.bf16 %v1611_v3, %v1607_v2 }
 0x2ef   : > { %v1718_v9 = vpack.c.bf16 %v1613_v6, %v1609_v5 }
 0x2f0   : > { %v1749_v14 = vmax.bf16 %v2825_v13, %v1717_v7 }
 0x2f1   : > { %v1616_v10 = vpop.f32.mrb[92].mxu0  ;;  %v1750_v11 = vmax.bf16 %v2825_v13, %v1718_v9 }
 0x2f2   : > { %v1618_v12 = vpop.f32.mrb[93].mxu0  ;;  %v1617_v16 = vadd.f32 %v1616_v10, %v3524_v62 }
 0x2f3   : > { %v1620_v15 = vpop.f32.mrb[94].mxu0  ;;  %1984 = vmatprep.mubr.bf16.mxu1 %v1750_v11  ;;  %v1619_v19 = vadd.f32 %v1618_v12, %v3528_v38 }
 0x2f4   : > { %v1621_v17 = vadd.f32 %v1620_v15, %v3524_v62  ;;  %v1622_v18 = vpop.f32.mrb[95].mxu0  ;;  %1985 = vmatmul.mubr.bf16.gmra.mrb[80].mxu1 %v1749_v14 }
 0x2f5   : > { %v1623_v20 = vadd.f32 %v1622_v18, %v3528_v38 }
 0x2f6   : > { %v1719_v21 = vpack.c.bf16 %v1621_v17, %v1617_v16 }
 0x2f7   : > { %v1720_v22 = vpack.c.bf16 %v1623_v20, %v1619_v19 }
 0x2f8   : > { %v1751_v25 = vmax.bf16 %v2825_v13, %v1719_v21 }
 0x2f9   : > { %v1626_v23 = vpop.f32.mrb[96].mxu0  ;;  %v1752_v24 = vmax.bf16 %v2825_v13, %v1720_v22 }
 0x2fa   : > { %v1628_v8 = vpop.f32.mrb[97].mxu0  ;;  %v1627_v27 = vadd.f32 %v1626_v23, %v3524_v62 }
 0x2fb   : > { %v1630_v26 = vpop.f32.mrb[98].mxu0  ;;  %1992 = vmatprep.mubr.bf16.mxu1 %v1752_v24  ;;  %v1629_v30 = vadd.f32 %v1628_v8, %v3528_v38 }
 0x2fc   : > { %v1631_v28 = vadd.f32 %v1630_v26, %v3524_v62  ;;  %v1632_v29 = vpop.f32.mrb[99].mxu0  ;;  %1993 = vmatmul.mubr.bf16.gmra.mrb[84].mxu1 %v1751_v25 }
 0x2fd   : > { %v1633_v31 = vadd.f32 %v1632_v29, %v3528_v38 }
 0x2fe   : > { %v1721_v32 = vpack.c.bf16 %v1631_v28, %v1627_v27 }
 0x2ff   : > { %v1722_v33 = vpack.c.bf16 %v1633_v31, %v1629_v30 }
 0x300   : > { %v1753_v37 = vmax.bf16 %v2825_v13, %v1721_v32 }
 0x301   : > { %v1636_v34 = vpop.f32.mrb[100].mxu0  ;;  %v1754_v35 = vmax.bf16 %v2825_v13, %v1722_v33 }
 0x302   : > { %v1638_v36 = vpop.f32.mrb[101].mxu0  ;;  %v1637_v39 = vadd.f32 %v1636_v34, %v3524_v62 }
 0x303   : > { %v1640_v0 = vpop.f32.mrb[102].mxu0  ;;  %2000 = vmatprep.mubr.bf16.mxu1 %v1754_v35  ;;  %v1639_v42 = vadd.f32 %v1638_v36, %v3528_v38  ;;  %v2163_v36 = vld [vmem:[%s3770_s8 + $0x10] sm:$0xff] }
 0x304   : > { %v1641_v40 = vadd.f32 %v1640_v0, %v3524_v62  ;;  %v1642_v41 = vpop.f32.mrb[103].mxu0  ;;  %2001 = vmatmul.mubr.bf16.gmra.mrb[88].mxu1 %v1753_v37  ;;  %2189 = vperm.xlu1 %2694, %v2163_v36  }
 0x305   : > { %v1643_v43 = vadd.f32 %v1642_v41, %v3528_v38 }
 0x306   : > { %v1723_v44 = vpack.c.bf16 %v1641_v40, %v1637_v39 }
 0x307   : > { %v1724_v45 = vpack.c.bf16 %v1643_v43, %v1639_v42  ;;  %v2164_v42 = vld [vmem:[%s3770_s8 + $0x18] sm:$0xff] }
 0x308   : > { %v1755_v48 = vmax.bf16 %v2825_v13, %v1723_v44  ;;  %2194 = vperm.xlu1 %2694, %v2164_v42  }
 0x309   : > { %v1646_v46 = vpop.f32.mrb[104].mxu0  ;;  %v1756_v61 = vmax.bf16 %v2825_v13, %v1724_v45 }
 0x30a   : > { %v1648_v47 = vpop.f32.mrb[105].mxu0  ;;  %v1647_v50 = vadd.f32 %v1646_v46, %v3524_v62 }
 0x30b   : > { %v1650_v49 = vpop.f32.mrb[106].mxu0  ;;  %2008 = vmatprep.mubr.bf16.mxu1 %v1756_v61  ;;  %v1649_v53 = vadd.f32 %v1648_v47, %v3528_v38 }
 0x30c   : > { %v1651_v51 = vadd.f32 %v1650_v49, %v3524_v62  ;;  %v1652_v52 = vpop.f32.mrb[107].mxu0  ;;  %2009 = vmatmul.mubr.bf16.gmra.mrb[92].mxu1 %v1755_v48  ;;  %v2166_v49 = vld [vmem:[%s3770_s8 + $0x28] sm:$0xff] }
 0x30d   : > { %v1653_v54 = vadd.f32 %v1652_v52, %v3528_v38  ;;  %2204 = vperm.xlu1 %2694, %v2166_v49  }
 0x30e   : > { %v1725_v57 = vpack.c.bf16 %v1651_v51, %v1647_v50 }
 0x30f   : > { %v1726_v58 = vpack.c.bf16 %v1653_v54, %v1649_v53 }
 0x310   : > { %v1757_v2 = vmax.bf16 %v2825_v13, %v1725_v57  ;;  %v2168_v57 = vld [vmem:[%s3770_s8 + $0x38] sm:$0xff] }
 0x311   : > { %v1656_v60 = vpop.f32.mrb[108].mxu0  ;;  %v1758_v63 = vmax.bf16 %v2825_v13, %v1726_v58  ;;  %2214 = vperm.xlu1 %2694, %v2168_v57  }
 0x312   : > { %v1658_v1 = vpop.f32.mrb[109].mxu0  ;;  %v1657_v4 = vadd.f32 %v1656_v60, %v3524_v62 }
 0x313   : > { %v1660_v3 = vpop.f32.mrb[110].mxu0  ;;  %2016 = vmatprep.mubr.bf16.mxu1 %v1758_v63  ;;  %v1659_v7 = vadd.f32 %v1658_v1, %v3528_v38 }
 0x314   : > { %v1661_v5 = vadd.f32 %v1660_v3, %v3524_v62  ;;  %v1662_v6 = vpop.f32.mrb[111].mxu0  ;;  %2017 = vmatmul.mubr.bf16.gmra.mrb[96].mxu1 %v1757_v2 }
 0x315   : > { %v1663_v9 = vadd.f32 %v1662_v6, %v3528_v38 }
 0x316   : > { %v1727_v10 = vpack.c.bf16 %v1661_v5, %v1657_v4  ;;  %v2170_v5 = vld [vmem:[%s3770_s8 + $0x48] sm:$0xff] }
 0x317   : > { %v1728_v11 = vpack.c.bf16 %v1663_v9, %v1659_v7  ;;  %2224 = vperm.xlu1 %2694, %v2170_v5  }
 0x318   : > { %v1759_v16 = vmax.bf16 %v2825_v13, %v1727_v10 }
 0x319   : > { %v1666_v12 = vpop.f32.mrb[112].mxu0  ;;  %v1760_v14 = vmax.bf16 %v2825_v13, %v1728_v11 }
 0x31a   : > { %v1668_v15 = vpop.f32.mrb[113].mxu0  ;;  %v1667_v18 = vadd.f32 %v1666_v12, %v3524_v62 }
 0x31b   : > { %v1670_v17 = vpop.f32.mrb[114].mxu0  ;;  %2024 = vmatprep.mubr.bf16.mxu1 %v1760_v14  ;;  %v1669_v21 = vadd.f32 %v1668_v15, %v3528_v38  ;;  %v3671_v14 = vld [vmem:[%s3769_s7] ss:$0 sm:$0xff] }
 0x31c   : > { %v1671_v19 = vadd.f32 %v1670_v17, %v3524_v62  ;;  %v1672_v20 = vpop.f32.mrb[115].mxu0  ;;  %2025 = vmatmul.mubr.bf16.gmra.mrb[100].mxu1 %v1759_v16 }
 0x31d   : > { %v1673_v22 = vadd.f32 %v1672_v20, %v3528_v38 }
 0x31e   : > { %v1729_v23 = vpack.c.bf16 %v1671_v19, %v1667_v18 }
 0x31f   : > { %v1730_v24 = vpack.c.bf16 %v1673_v22, %v1669_v21 }
 0x320   : > { %v1761_v27 = vmax.bf16 %v2825_v13, %v1729_v23 }
 0x321   : > { %v1676_v8 = vpop.f32.mrb[116].mxu0  ;;  %v1762_v25 = vmax.bf16 %v2825_v13, %v1730_v24 }
 0x322   : > { %v1678_v26 = vpop.f32.mrb[117].mxu0  ;;  %v1677_v29 = vadd.f32 %v1676_v8, %v3524_v62 }
 0x323   : > { %v1680_v28 = vpop.f32.mrb[118].mxu0  ;;  %2032 = vmatprep.mubr.bf16.mxu1 %v1762_v25  ;;  %v1679_v32 = vadd.f32 %v1678_v26, %v3528_v38 }
 0x324   : > { %v1681_v30 = vadd.f32 %v1680_v28, %v3524_v62  ;;  %v1682_v31 = vpop.f32.mrb[119].mxu0  ;;  %2033 = vmatmul.mubr.bf16.gmra.mrb[104].mxu1 %v1761_v27 }
 0x325   : > { %v1683_v33 = vadd.f32 %v1682_v31, %v3528_v38 }
 0x326   : > { %v1731_v34 = vpack.c.bf16 %v1681_v30, %v1677_v29 }
 0x327   : > { %v1732_v35 = vpack.c.bf16 %v1683_v33, %v1679_v32 }
 0x328   : > { %v1763_v40 = vmax.bf16 %v2825_v13, %v1731_v34 }
 0x329   : > { %v1686_v37 = vpop.f32.mrb[120].mxu0  ;;  %v1764_v0 = vmax.bf16 %v2825_v13, %v1732_v35 }
 0x32a   : > { %v1688_v39 = vpop.f32.mrb[121].mxu0  ;;  %v1687_v43 = vadd.f32 %v1686_v37, %v3524_v62 }
 0x32b   : > { %v1690_v41 = vpop.f32.mrb[122].mxu0  ;;  %2040 = vmatprep.mubr.bf16.mxu1 %v1764_v0  ;;  %v1689_v46 = vadd.f32 %v1688_v39, %v3528_v38 }
 0x32c   : > { %v1691_v44 = vadd.f32 %v1690_v41, %v3524_v62  ;;  %v1692_v45 = vpop.f32.mrb[123].mxu0  ;;  %2041 = vmatmul.mubr.bf16.gmra.mrb[108].mxu1 %v1763_v40 }
 0x32d   : > { %v1693_v61 = vadd.f32 %v1692_v45, %v3528_v38 }
 0x32e   : > { %v1733_v47 = vpack.c.bf16 %v1691_v44, %v1687_v43 }
 0x32f   : > { %v1734_v48 = vpack.c.bf16 %v1693_v61, %v1689_v46 }
 0x330   : > { %v1765_v53 = vmax.bf16 %v2825_v13, %v1733_v47 }
 0x331   : > { %v1696_v50 = vpop.f32.mrb[124].mxu0  ;;  %v1766_v51 = vmax.bf16 %v2825_v13, %v1734_v48 }
 0x332   : > { %v1698_v52 = vpop.f32.mrb[125].mxu0  ;;  %v1697_v58 = vadd.f32 %v1696_v50, %v3524_v62 }
 0x333   : > { %v1700_v54 = vpop.f32.mrb[126].mxu0  ;;  %2048 = vmatprep.mubr.bf16.mxu1 %v1766_v51  ;;  %v1699_v1 = vadd.f32 %v1698_v52, %v3528_v38 }
 0x334   : > { %v1701_v60 = vadd.f32 %v1700_v54, %v3524_v62  ;;  %v1702_v63 = vpop.f32.mrb[127].mxu0  ;;  %2049 = vmatmul.mubr.bf16.gmra.mrb[112].mxu1 %v1765_v53  ;;  %v2172_v62 = vld [vmem:[%s3770_s8 + $0x58] sm:$0xff] }
 0x335   : > { %v1703_v2 = vadd.f32 %v1702_v63, %v3528_v38  ;;  %2234 = vperm.xlu1 %2694, %v2172_v62   ;;  %v2174_v38 = vld [vmem:[%s3770_s8 + $0x68] sm:$0xff] }
 0x336   : > { %v1735_v3 = vpack.c.bf16 %v1701_v60, %v1697_v58 }
 0x337   : > { %v1736_v4 = vpack.c.bf16 %v1703_v2, %v1699_v1 }
 0x338   : > { %v1767_v7 = vmax.bf16 %v2825_v13, %v1735_v3 }
 0x339   : > { %v1768_v6 = vmax.bf16 %v2825_v13, %v1736_v4  ;;  %2244 = vperm.xlu1 %2694, %v2174_v38  }
 0x33b   : > { %2056 = vmatprep.mubr.bf16.mxu1 %v1768_v6 }
 0x33c   : > { %2057 = vmatmul.mubr.bf16.gmra.mrb[116].mxu1 %v1767_v7 }
 0x397   : > { %v2537_v9 = vpop.f32.mrb[128].mxu0 }
 0x398   : > { %v2538_v10 = vpop.f32.mrb[129].mxu0 }
 0x399   : > { %v2539_v11 = vadd.f32 %v2538_v10, %v2537_v9  ;;  %v2540_v12 = vpop.f32.mrb[130].mxu0 }
 0x39a   : > { %v2541_v15 = vpop.f32.mrb[131].mxu0 }
 0x39b   : > { %v2542_v16 = vadd.f32 %v2541_v15, %v2540_v12  ;;  %v1939_v17 = vadd.f32 %v2539_v11, %v3671_v14 }
 0x39d   : > { %v1942_v18 = vadd.f32 %v2542_v16, %v3671_v14 }
 0x39f   : > { %v2065_v19 = vpack.c.bf16 %v1942_v18, %v1939_v17  ;;  %v2543_v20 = vpop.f32.mrb[132].mxu0 }
 0x3a0   : > { %v2544_v21 = vpop.f32.mrb[133].mxu0 }
 0x3a1   : > { %v2545_v22 = vadd.f32 %v2544_v21, %v2543_v20  ;;  %v2546_v23 = vpop.f32.mrb[134].mxu0  ;;  %v2081_v24 = vmax.bf16 %v2825_v13, %v2065_v19 }
 0x3a2   : > { %v2547_v8 = vpop.f32.mrb[135].mxu0 }
 0x3a3   : > { %v2548_v25 = vadd.f32 %v2547_v8, %v2546_v23  ;;  %2097 = vxpose.xlu0.c.b16.start [1/8] %v2081_v24, 128  ;;  %v1947_v26 = vadd.f32 %v2545_v22, %v3671_v14 }
 0x3a5   : > { %v1950_v27 = vadd.f32 %v2548_v25, %v3671_v14 }
 0x3a7   : > { %v2066_v28 = vpack.c.bf16 %v1950_v27, %v1947_v26  ;;  %v2549_v29 = vpop.f32.mrb[64].mxu1 }
 0x3a8   : > { %v2550_v30 = vpop.f32.mrb[65].mxu1 }
 0x3a9   : > { %v2082_v31 = vmax.bf16 %v2825_v13, %v2066_v28  ;;  %v2551_v32 = vadd.f32 %v2550_v30, %v2549_v29  ;;  %v2552_v33 = vpop.f32.mrb[66].mxu1 }
 0x3aa   : > { %v2553_v34 = vpop.f32.mrb[67].mxu1 }
 0x3ab   : > { %v2554_v35 = vadd.f32 %v2553_v34, %v2552_v33  ;;  %2098 = vxpose.xlu0.c.b16.cont [2/8] %v2082_v31, 128  ;;  %v1955_v36 = vadd.f32 %v2551_v32, %v3671_v14 }
 0x3ad   : > { %v1958_v37 = vadd.f32 %v2554_v35, %v3671_v14 }
 0x3af   : > { %v2067_v0 = vpack.c.bf16 %v1958_v37, %v1955_v36  ;;  %v2555_v39 = vpop.f32.mrb[68].mxu1 }
 0x3b0   : > { %v2556_v40 = vpop.f32.mrb[69].mxu1 }
 0x3b1   : > { %v2083_v41 = vmax.bf16 %v2825_v13, %v2067_v0  ;;  %v2557_v42 = vadd.f32 %v2556_v40, %v2555_v39  ;;  %v2558_v43 = vpop.f32.mrb[70].mxu1 }
 0x3b2   : > { %v2559_v44 = vpop.f32.mrb[71].mxu1 }
 0x3b3   : > { %v2560_v45 = vadd.f32 %v2559_v44, %v2558_v43  ;;  %2099 = vxpose.xlu0.c.b16.cont [3/8] %v2083_v41, 128  ;;  %v1963_v46 = vadd.f32 %v2557_v42, %v3671_v14 }
 0x3b5   : > { %v1966_v61 = vadd.f32 %v2560_v45, %v3671_v14  ;;  %v2175_v45 = vld [vmem:[%s3770_s8 + $0x70] sm:$0xff] }
 0x3b7   : > { %v2068_v47 = vpack.c.bf16 %v1966_v61, %v1963_v46  ;;  %v2561_v48 = vpop.f32.mrb[72].mxu1 }
 0x3b8   : > { %v2562_v49 = vpop.f32.mrb[73].mxu1 }
 0x3b9   : > { %v2084_v50 = vmax.bf16 %v2825_v13, %v2068_v47  ;;  %v2563_v51 = vadd.f32 %v2562_v49, %v2561_v48  ;;  %v2564_v52 = vpop.f32.mrb[74].mxu1  ;;  %v2331_v49 = vld [vmem:[#allocation3] sm:$0x1] }
 0x3ba   : > { %v2565_v53 = vpop.f32.mrb[75].mxu1 }
 0x3bb   : > { %v2566_v54 = vadd.f32 %v2565_v53, %v2564_v52  ;;  %2100 = vxpose.xlu0.c.b16.cont [4/8] %v2084_v50, 128  ;;  %v1971_v57 = vadd.f32 %v2563_v51, %v3671_v14 }
 0x3bd   : > { %v1974_v58 = vadd.f32 %v2566_v54, %v3671_v14 }
 0x3bf   : > { %v2069_v60 = vpack.c.bf16 %v1974_v58, %v1971_v57  ;;  %v2567_v63 = vpop.f32.mrb[76].mxu1 }
 0x3c0   : > { %v2568_v1 = vpop.f32.mrb[77].mxu1 }
 0x3c1   : > { %v2085_v2 = vmax.bf16 %v2825_v13, %v2069_v60  ;;  %v2569_v3 = vadd.f32 %v2568_v1, %v2567_v63  ;;  %v2570_v4 = vpop.f32.mrb[78].mxu1 }
 0x3c2   : > { %v2571_v5 = vpop.f32.mrb[79].mxu1 }
 0x3c3   : > { %v2572_v6 = vadd.f32 %v2571_v5, %v2570_v4  ;;  %2101 = vxpose.xlu0.c.b16.cont [5/8] %v2085_v2, 128  ;;  %v1979_v7 = vadd.f32 %v2569_v3, %v3671_v14 }
 0x3c5   : > { %v1982_v62 = vadd.f32 %v2572_v6, %v3671_v14 }
 0x3c7   : > { %v2070_v38 = vpack.c.bf16 %v1982_v62, %v1979_v7  ;;  %v2573_v9 = vpop.f32.mrb[80].mxu1 }
 0x3c8   : > { %v2574_v10 = vpop.f32.mrb[81].mxu1 }
 0x3c9   : > { %v2086_v11 = vmax.bf16 %v2825_v13, %v2070_v38  ;;  %v2575_v12 = vadd.f32 %v2574_v10, %v2573_v9  ;;  %v2576_v15 = vpop.f32.mrb[82].mxu1 }
 0x3ca   : > { %v2577_v16 = vpop.f32.mrb[83].mxu1 }
 0x3cb   : > { %v2578_v17 = vadd.f32 %v2577_v16, %v2576_v15  ;;  %2102 = vxpose.xlu0.c.b16.cont [6/8] %v2086_v11, 128  ;;  %v1987_v18 = vadd.f32 %v2575_v12, %v3671_v14 }
 0x3cd   : > { %v1990_v19 = vadd.f32 %v2578_v17, %v3671_v14 }
 0x3cf   : > { %v2071_v20 = vpack.c.bf16 %v1990_v19, %v1987_v18  ;;  %v2579_v21 = vpop.f32.mrb[84].mxu1 }
 0x3d0   : > { %v2580_v22 = vpop.f32.mrb[85].mxu1 }
 0x3d1   : > { %v2087_v23 = vmax.bf16 %v2825_v13, %v2071_v20  ;;  %v2581_v24 = vadd.f32 %v2580_v22, %v2579_v21  ;;  %v2582_v8 = vpop.f32.mrb[86].mxu1 }
 0x3d2   : > { %v2583_v25 = vpop.f32.mrb[87].mxu1 }
 0x3d3   : > { %v2584_v26 = vadd.f32 %v2583_v25, %v2582_v8  ;;  %2103 = vxpose.xlu0.c.b16.cont [7/8] %v2087_v23, 128  ;;  %v1995_v27 = vadd.f32 %v2581_v24, %v3671_v14 }
 0x3d5   : > { %v1998_v28 = vadd.f32 %v2584_v26, %v3671_v14 }
 0x3d7   : > { %v2072_v29 = vpack.c.bf16 %v1998_v28, %v1995_v27  ;;  %v2585_v30 = vpop.f32.mrb[88].mxu1 }
 0x3d8   : > { %v2586_v31 = vpop.f32.mrb[89].mxu1 }
 0x3d9   : > { %v2088_v32 = vmax.bf16 %v2825_v13, %v2072_v29  ;;  %v2587_v33 = vadd.f32 %v2586_v31, %v2585_v30  ;;  %v2588_v34 = vpop.f32.mrb[90].mxu1 }
 0x3da   : > { %v2589_v35 = vpop.f32.mrb[91].mxu1 }
 0x3db   : > { %v2590_v36 = vadd.f32 %v2589_v35, %v2588_v34  ;;  %2104 = vxpose.xlu0.c.b16.end [8/8] %v2088_v32, 128  ;;  %v2003_v37 = vadd.f32 %v2587_v33, %v3671_v14 }
 0x3dd   : > { %v2006_v0 = vadd.f32 %v2590_v36, %v3671_v14 }
 0x3df   : > { %v2073_v39 = vpack.c.bf16 %v2006_v0, %v2003_v37  ;;  %v2591_v40 = vpop.f32.mrb[92].mxu1 }
 0x3e0   : > { %v2592_v41 = vpop.f32.mrb[93].mxu1 }
 0x3e1   : > { %v2593_v42 = vadd.f32 %v2592_v41, %v2591_v40  ;;  %v2594_v43 = vpop.f32.mrb[94].mxu1  ;;  %v2089_v44 = vmax.bf16 %v2825_v13, %v2073_v39 }
 0x3e2   : > { %v2595_v46 = vpop.f32.mrb[95].mxu1 }
 0x3e3   : > { %v2596_v61 = vadd.f32 %v2595_v46, %v2594_v43  ;;  %2113 = vxpose.xlu1.c.b16.start [1/8] %v2089_v44, 128  ;;  %v2011_v47 = vadd.f32 %v2593_v42, %v3671_v14 }
 0x3e4   : > { %2249 = vperm.xlu0 %2693, %v2175_v45  }
 0x3e5   : > { %v2014_v48 = vadd.f32 %v2596_v61, %v3671_v14 }
 0x3e7   : > { %v2074_v50 = vpack.c.bf16 %v2014_v48, %v2011_v47  ;;  %v2597_v51 = vpop.f32.mrb[96].mxu1 }
 0x3e8   : > { %v2598_v52 = vpop.f32.mrb[97].mxu1  ;;  %2334 = vperm.xlu0 %2693, %v2331_v49  }
 0x3e9   : > { %v2090_v53 = vmax.bf16 %v2825_v13, %v2074_v50  ;;  %v2599_v54 = vadd.f32 %v2598_v52, %v2597_v51  ;;  %v2600_v57 = vpop.f32.mrb[98].mxu1 }
 0x3ea   : > { %v2601_v58 = vpop.f32.mrb[99].mxu1 }
 0x3eb   : > { %v2602_v60 = vadd.f32 %v2601_v58, %v2600_v57  ;;  %2114 = vxpose.xlu1.c.b16.cont [2/8] %v2090_v53, 128  ;;  %v2019_v63 = vadd.f32 %v2599_v54, %v3671_v14  ;;  %v2176_v53 = vld [vmem:[%s3770_s8 + $0x78] sm:$0xff]  ;;  %v2180_v54 = vpop.permute.xlu0 %2179  ;;  %v2190_v58 = vpop.permute.xlu1 %2189 }
 0x3ed   : > { %v2022_v1 = vadd.f32 %v2602_v60, %v3671_v14 }
 0x3ef   : > { %v2075_v2 = vpack.c.bf16 %v2022_v1, %v2019_v63  ;;  %v2603_v3 = vpop.f32.mrb[100].mxu1  ;;  %v2185_v57 = vpop.permute.xlu0 %2184 }
 0x3f0   : > { %v2604_v4 = vpop.f32.mrb[101].mxu1  ;;  %v2195_v63 = vpop.permute.xlu1 %2194 }
 0x3f1   : > { %v2091_v5 = vmax.bf16 %v2825_v13, %v2075_v2  ;;  %v2605_v6 = vadd.f32 %v2604_v4, %v2603_v3  ;;  %v2606_v7 = vpop.f32.mrb[102].mxu1 }
 0x3f2   : > { %v2607_v62 = vpop.f32.mrb[103].mxu1 }
 0x3f3   : > { %v2608_v38 = vadd.f32 %v2607_v62, %v2606_v7  ;;  %2115 = vxpose.xlu1.c.b16.cont [3/8] %v2091_v5, 128  ;;  %v2027_v9 = vadd.f32 %v2605_v6, %v3671_v14  ;;  %v2200_v60 = vpop.permute.xlu0 %2199 }
 0x3f4   : > { %v2205_v2 = vpop.permute.xlu1 %2204 }
 0x3f5   : > { %v2030_v10 = vadd.f32 %v2608_v38, %v3671_v14 }
 0x3f7   : > { %v2076_v11 = vpack.c.bf16 %v2030_v10, %v2027_v9  ;;  %v2609_v12 = vpop.f32.mrb[104].mxu1  ;;  %v2210_v1 = vpop.permute.xlu0 %2209 }
 0x3f8   : > { %v2610_v15 = vpop.f32.mrb[105].mxu1  ;;  %v2215_v4 = vpop.permute.xlu1 %2214 }
 0x3f9   : > { %v2092_v16 = vmax.bf16 %v2825_v13, %v2076_v11  ;;  %v2611_v17 = vadd.f32 %v2610_v15, %v2609_v12  ;;  %v2612_v18 = vpop.f32.mrb[106].mxu1 }
 0x3fa   : > { %v2613_v19 = vpop.f32.mrb[107].mxu1 }
 0x3fb   : > { %v2614_v20 = vadd.f32 %v2613_v19, %v2612_v18  ;;  %2116 = vxpose.xlu1.c.b16.cont [4/8] %v2092_v16, 128  ;;  %v2035_v21 = vadd.f32 %v2611_v17, %v3671_v14  ;;  %v3727_v3 = vpop.permute.xlu0 %2219 }
 0x3fc   : > { %v3731_v5 = vpop.permute.xlu1 %2224 }
 0x3fd   : > { %v2038_v22 = vadd.f32 %v2614_v20, %v3671_v14 }
 0x3ff   : > { %v2077_v23 = vpack.c.bf16 %v2038_v22, %v2035_v21  ;;  %v2615_v24 = vpop.f32.mrb[108].mxu1 }
 0x400   : > { %v2616_v8 = vpop.f32.mrb[109].mxu1  ;;  %v3735_v6 = vpop.permute.xlu1 %2234 }
 0x401   : > { %v2093_v25 = vmax.bf16 %v2825_v13, %v2077_v23  ;;  %v2617_v26 = vadd.f32 %v2616_v8, %v2615_v24  ;;  %v2618_v27 = vpop.f32.mrb[110].mxu1 }
 0x402   : > { %v2619_v28 = vpop.f32.mrb[111].mxu1 }
 0x403   : > { %v2620_v29 = vadd.f32 %v2619_v28, %v2618_v27  ;;  %2117 = vxpose.xlu1.c.b16.cont [5/8] %v2093_v25, 128  ;;  %v2043_v30 = vadd.f32 %v2617_v26, %v3671_v14 }
 0x404   : > { %v3737_v62 = vpop.permute.xlu1 %2244 }
 0x405   : > { %v2046_v31 = vadd.f32 %v2620_v29, %v3671_v14 }
 0x407   : > { %v2078_v32 = vpack.c.bf16 %v2046_v31, %v2043_v30  ;;  %v2621_v33 = vpop.f32.mrb[112].mxu1 }
 0x408   : > { %v2622_v34 = vpop.f32.mrb[113].mxu1 }
 0x409   : > { %v2094_v35 = vmax.bf16 %v2825_v13, %v2078_v32  ;;  %v2623_v36 = vadd.f32 %v2622_v34, %v2621_v33  ;;  %v2624_v37 = vpop.f32.mrb[114].mxu1 }
 0x40a   : > { %v2625_v0 = vpop.f32.mrb[115].mxu1 }
 0x40b   : > { %v2626_v39 = vadd.f32 %v2625_v0, %v2624_v37  ;;  %2118 = vxpose.xlu1.c.b16.cont [6/8] %v2094_v35, 128  ;;  %v2051_v40 = vadd.f32 %v2623_v36, %v3671_v14 }
 0x40d   : > { %v2054_v41 = vadd.f32 %v2626_v39, %v3671_v14 }
 0x40f   : > { %v2079_v42 = vpack.c.bf16 %v2054_v41, %v2051_v40  ;;  %v2627_v43 = vpop.f32.mrb[116].mxu1 }
 0x410   : > { %v2628_v44 = vpop.f32.mrb[117].mxu1 }
 0x411   : > { %v2095_v45 = vmax.bf16 %v2825_v13, %v2079_v42  ;;  %v2629_v46 = vadd.f32 %v2628_v44, %v2627_v43  ;;  %v2630_v61 = vpop.f32.mrb[118].mxu1 }
 0x412   : > { %v2631_v47 = vpop.f32.mrb[119].mxu1 }
 0x413   : > { %v2632_v48 = vadd.f32 %v2631_v47, %v2630_v61  ;;  %2119 = vxpose.xlu1.c.b16.cont [7/8] %v2095_v45, 128  ;;  %v2059_v49 = vadd.f32 %v2629_v46, %v3671_v14 }
 0x415   : > { %v2062_v50 = vadd.f32 %v2632_v48, %v3671_v14  ;;  %v3729_v14 = vpop.permute.xlu0 %2229 }
 0x417   : > { %v2080_v51 = vpack.c.bf16 %v2062_v50, %v2059_v49 }
 0x419   : > { %v2096_v52 = vmax.bf16 %v2825_v13, %v2080_v51  ;;  %v3733_v13 = vpop.permute.xlu0 %2239 }
 0x41b   : > { %2120 = vxpose.xlu1.c.b16.end [8/8] %v2096_v52, 128 }
 0x41f   : > { %2254 = vperm.xlu1 %2694, %v2176_v53  }
 0x425   : > { %v2105_v7 = vpop.trf.xlu0 }
 0x426   : > { %v2129_v38 = vunpack.c.l.bf16 %v2105_v7  ;;  %v2131_v9 = vunpack.c.h.bf16 %v2105_v7 }
 0x428   : > { %v2257_v16 = vmul.f32 %v2180_v54, %v2129_v38  ;;  %v2259_v17 = vmul.f32 %v2185_v57, %v2131_v9 }
 0x429   : > { %v2106_v11 = vpop.trf.xlu0 }
 0x42a   : > { %v2133_v18 = vunpack.c.l.bf16 %v2106_v11  ;;  %v2289_v23 = vadd.f32 %v2259_v17, %v2257_v16  ;;  %v2135_v8 = vunpack.c.h.bf16 %v2106_v11 }
 0x42c   : > { %v2261_v25 = vmul.f32 %v2190_v58, %v2133_v18  ;;  %v2263_v32 = vmul.f32 %v2195_v63, %v2135_v8 }
 0x42d   : > { %v2107_v29 = vpop.trf.xlu0 }
 0x42e   : > { %v2290_v33 = vadd.f32 %v2289_v23, %v2261_v25  ;;  %v2137_v34 = vunpack.c.l.bf16 %v2107_v29  ;;  %v2139_v40 = vunpack.c.h.bf16 %v2107_v29 }
 0x430   : > { %v2291_v39 = vadd.f32 %v2290_v33, %v2263_v32  ;;  %v2265_v41 = vmul.f32 %v2200_v60, %v2137_v34  ;;  %v2267_v46 = vmul.f32 %v2205_v2, %v2139_v40 }
 0x431   : > { %v2108_v43 = vpop.trf.xlu0 }
 0x432   : > { %v2292_v61 = vadd.f32 %v2291_v39, %v2265_v41  ;;  %v2141_v47 = vunpack.c.l.bf16 %v2108_v43  ;;  %v2143_v53 = vunpack.c.h.bf16 %v2108_v43 }
 0x434   : > { %v2293_v52 = vadd.f32 %v2292_v61, %v2267_v46  ;;  %v2271_v38 = vmul.f32 %v2215_v4, %v2143_v53 }
 0x465   : > { %v2121_v10 = vpop.trf.xlu1 }
 0x466   : > { %v2130_v12 = vunpack.c.l.bf16 %v2121_v10  ;;  %v2132_v15 = vunpack.c.h.bf16 %v2121_v10 }
 0x468   : > { %v2258_v19 = vmul.f32 %v2180_v54, %v2130_v12  ;;  %v2260_v20 = vmul.f32 %v2185_v57, %v2132_v15  ;;  %v2269_v54 = vmul.f32 %v2210_v1, %v2141_v47 }
 0x469   : > { %v2122_v21 = vpop.trf.xlu1 }
 0x46a   : > { %v2134_v22 = vunpack.c.l.bf16 %v2122_v21  ;;  %v2310_v26 = vadd.f32 %v2260_v20, %v2258_v19  ;;  %v2136_v27 = vunpack.c.h.bf16 %v2122_v21 }
 0x46c   : > { %v2262_v24 = vmul.f32 %v2190_v58, %v2134_v22  ;;  %v2264_v35 = vmul.f32 %v2195_v63, %v2136_v27  ;;  %v2109_v58 = vpop.trf.xlu0 }
 0x46d   : > { %v2123_v28 = vpop.trf.xlu1  ;;  %v2145_v9 = vunpack.c.l.bf16 %v2109_v58 }
 0x46e   : > { %v2311_v30 = vadd.f32 %v2310_v26, %v2262_v24  ;;  %v2138_v31 = vunpack.c.l.bf16 %v2123_v28  ;;  %v2140_v42 = vunpack.c.h.bf16 %v2123_v28 }
 0x46f   : > { %v2273_v17 = vmul.f32 %v3727_v3, %v2145_v9 }
 0x470   : > { %v2312_v36 = vadd.f32 %v2311_v30, %v2264_v35  ;;  %v2266_v37 = vmul.f32 %v2200_v60, %v2138_v31  ;;  %v2268_v48 = vmul.f32 %v2205_v2, %v2140_v42  ;;  %v2294_v60 = vadd.f32 %v2293_v52, %v2269_v54  ;;  %v2110_v19 = vpop.trf.xlu0 }
 0x471   : > { %v2124_v0 = vpop.trf.xlu1  ;;  %v2147_v2 = vunpack.c.h.bf16 %v2109_v58  ;;  %v2149_v23 = vunpack.c.l.bf16 %v2110_v19  ;;  %v2151_v27 = vunpack.c.h.bf16 %v2110_v19 }
 0x472   : > { %v2313_v44 = vadd.f32 %v2312_v36, %v2266_v37  ;;  %v2142_v45 = vunpack.c.l.bf16 %v2124_v0  ;;  %v2144_v57 = vunpack.c.h.bf16 %v2124_v0  ;;  %v2295_v16 = vadd.f32 %v2294_v60, %v2271_v38 }
 0x473   : > { %v2275_v21 = vmul.f32 %v3731_v5, %v2147_v2  ;;  %v2277_v28 = vmul.f32 %v3729_v14, %v2149_v23  ;;  %v2279_v32 = vmul.f32 %v3735_v6, %v2151_v27 }
 0x474   : > { %v2314_v49 = vadd.f32 %v2313_v44, %v2268_v48  ;;  %v2270_v50 = vmul.f32 %v2210_v1, %v2142_v45  ;;  %v2272_v10 = vmul.f32 %v2215_v4, %v2144_v57  ;;  %v2296_v22 = vadd.f32 %v2295_v16, %v2273_v17 }
 0x475   : > { %v2125_v51 = vpop.trf.xlu1 }
 0x476   : > { %v2315_v63 = vadd.f32 %v2314_v49, %v2270_v50  ;;  %v2146_v7 = vunpack.c.l.bf16 %v2125_v51  ;;  %v2148_v18 = vunpack.c.h.bf16 %v2125_v51  ;;  %v2297_v26 = vadd.f32 %v2296_v22, %v2275_v21 }
 0x478   : > { %v2316_v11 = vadd.f32 %v2315_v63, %v2272_v10  ;;  %v2274_v12 = vmul.f32 %v3727_v3, %v2146_v7  ;;  %v2276_v24 = vmul.f32 %v3731_v5, %v2148_v18  ;;  %v2111_v3 = vpop.trf.xlu0  ;;  %v2298_v33 = vadd.f32 %v2297_v26, %v2277_v28 }
 0x479   : > { %v2126_v15 = vpop.trf.xlu1  ;;  %v2153_v34 = vunpack.c.l.bf16 %v2111_v3  ;;  %v2155_v40 = vunpack.c.h.bf16 %v2111_v3  ;;  %v2826_v26 = vmov 1966171168  }
 0x47a   : > { %v2317_v20 = vadd.f32 %v2316_v11, %v2274_v12  ;;  %v2150_v1 = vunpack.c.l.bf16 %v2126_v15  ;;  %v2152_v29 = vunpack.c.h.bf16 %v2126_v15  ;;  %v2299_v39 = vadd.f32 %v2298_v33, %v2279_v32 }
 0x47b   : > { %v2281_v41 = vmul.f32 %v3733_v13, %v2153_v34  ;;  %v2283_v46 = vmul.f32 %v3737_v62, %v2155_v40  ;;  %v2359_v27 = vunpack.c.l.s4 %v2826_v26 }
 0x47c   : > { %v2318_v8 = vadd.f32 %v2317_v20, %v2276_v24  ;;  %v2278_v4 = vmul.f32 %v3729_v14, %v2150_v1  ;;  %v2280_v35 = vmul.f32 %v3735_v6, %v2152_v29  ;;  %v2112_v36 = vpop.trf.xlu0 }
 0x47d   : > { %v2127_v25 = vpop.trf.xlu1  ;;  %v2157_v42 = vunpack.c.l.bf16 %v2112_v36  ;;  %v2300_v61 = vadd.f32 %v2299_v39, %v2281_v41  ;;  %v2159_v51 = vunpack.c.h.bf16 %v2112_v36 }
 0x47e   : > { %v2319_v30 = vadd.f32 %v2318_v8, %v2278_v4  ;;  %v2154_v31 = vunpack.c.l.bf16 %v2127_v25  ;;  %v2156_v14 = vunpack.c.h.bf16 %v2127_v25 }
 0x47f   : > { %v2301_v50 = vadd.f32 %v2300_v61, %v2283_v46 }
 0x480   : > { %v2320_v5 = vadd.f32 %v2319_v30, %v2280_v35  ;;  %v2282_v37 = vmul.f32 %v3733_v13, %v2154_v31  ;;  %v2250_v45 = vpop.permute.xlu0 %2249  ;;  %v2284_v47 = vmul.f32 %v3737_v62, %v2156_v14 }
 0x481   : > { %v2128_v0 = vpop.trf.xlu1  ;;  %v2285_v6 = vmul.f32 %v2250_v45, %v2157_v42 }
 0x482   : > { %v2321_v43 = vadd.f32 %v2320_v5, %v2282_v37  ;;  %v2158_v44 = vunpack.c.l.bf16 %v2128_v0  ;;  %v2160_v52 = vunpack.c.h.bf16 %v2128_v0 }
 0x483   : > { %v2302_v54 = vadd.f32 %v2301_v50, %v2285_v6 }
 0x484   : > { %v2322_v48 = vadd.f32 %v2321_v43, %v2284_v47  ;;  %v2286_v49 = vmul.f32 %v2250_v45, %v2158_v44  ;;  %v2335_v16 = vpop.permute.xlu0 %2334 }
 0x485   : > { %v2340_v18 = vrot.slane %v2335_v16, %v3369_v59  ;;  %v2360_v59 = vunpack.c.0.s8 %v2359_v27 }
 0x486   : > { %v2323_v57 = vadd.f32 %v2322_v48, %v2286_v49 }
 0x487   : > { %v2363_v29 = vsub.s32 %v2360_v59, %v3360_v56 }
 0x49e   : > { %v2255_v53 = vpop.permute.xlu1 %2254 }
 0x49f   : > { %v2287_v13 = vmul.f32 %v2255_v53, %v2159_v51  ;;  %v2288_v58 = vmul.f32 %v2255_v53, %v2160_v52 }
 0x4a1   : > { %v2303_v63 = vadd.f32 %v2302_v54, %v2287_v13  ;;  %v2324_v7 = vadd.f32 %v2323_v57, %v2288_v58 }
 0x4a3   : > { %v2304_v38 = vrot.slane %v2303_v63, 4  ;;  %v2325_v60 = vrot.slane %v2324_v7, 4 }
 0x4a5   : > { %v2305_v9 = vadd.f32 %v2304_v38, %v2303_v63  ;;  %v2326_v10 = vadd.f32 %v2325_v60, %v2324_v7 }
 0x4a7   : > { %v2306_v11 = vrot.slane %v2305_v9, 2  ;;  %v2327_v12 = vrot.slane %v2326_v10, 2 }
 0x4a9   : > { %v2307_v62 = vadd.f32 %v2306_v11, %v2305_v9  ;;  %v2328_v15 = vadd.f32 %v2327_v12, %v2326_v10 }
 0x4ab   : > { %v2308_v2 = vrot.slane %v2307_v62, 1  ;;  %v2329_v17 = vrot.slane %v2328_v15, 1 }
 0x4ad   : > { %v2309_v19 = vadd.f32 %v2308_v2, %v2307_v62  ;;  %v2330_v20 = vadd.f32 %v2329_v17, %v2328_v15 }
 0x4af   : > { %v2341_v1 = vadd.f32 %v2340_v18, %v2309_v19  ;;  %v2342_v21 = vadd.f32 %v2340_v18, %v2330_v20 }
 0x4b1   : > { %v2517_v22 = vmul.f32 -1.442695, %v2341_v1  ;;  %v2518_v23 = vmul.f32 -1.442695, %v2342_v21 }
 0x4b3   : > { %2807 = vpow2.f32 %v2517_v22 }
 0x4b4   : > { %2809 = vpow2.f32 %v2518_v23 }
 0x4bd   : > { %v2808_v24 = vpop.eup %2807 }
 0x4be   : > { %v2810_v8 = vpop.eup %2809  ;;  %v2349_v4 = vadd.f32 1.0, %v2808_v24 }
 0x4bf   : > { %v2350_v25 = vadd.f32 1.0, %v2810_v8 }
 0x4c0   : > { %2811 = vrcp.f32 %v2349_v4 }
 0x4c1   : > { %2813 = vrcp.f32 %v2350_v25 }
 0x4ca   : > { %v2812_v28 = vpop.eup %2811 }
 0x4cb   : > { %v2814_v3 = vpop.eup %2813 }
 0x4cc   : > { %v2357_v30 = vcombine.low %v2812_v28, %v2814_v3 }
 0x4ce   : > { %v2364_v31 = vrot.slane %v2357_v30, %v2363_v29 }
 0x4d0   : > { %v2371_v32 = vrot.slane %v2364_v31, %v2363_v29 }
 0x4d2   : > { %2377 = vst.msk [vmem:[%s361_s21] sm:$0x3] %vm2375_vm2, %v2371_v32 }
 0x4d3 PF: > { %s22_s15 = sadd.s32 1, %s2821_s15  }
 0x4d4   : > { %p19_p5 = scmp.ge.s32.totalorder %s22_s15, 4  }
 0x4d6   :  { %21 = sbr.rel (!%p19_p5) target bundleno = 3 (0x3), region = 90 }

</bundles_post_ra>
